<compile_context>
chip_gen: v7x
topology: tpu7x:2x2x1
jax: 0.10.0
libtpu: 0.0.40
codegen_flags: <defaults>
</compile_context>

<pallas_src>
import functools

import jax
import jax.numpy as jnp
from jax.experimental import pallas as pl
from jax.experimental.pallas import tpu as pltpu

NEG_SLOPE = 0.01  # nn.LeakyReLU default


def _leaky_relu(x):
    return jnp.where(x >= 0, x, NEG_SLOPE * x)


def _round_up(x, m):
    return ((x + m - 1) // m) * m


def _pick_chunk(npad, bt, h):
    """Candidate-chunk size: keep BT*CN*H*4 bytes near vreg capacity."""
    budget = 128 * 1024
    for cand in (128, 64, 32, 16, 8):
        if npad % cand == 0 and bt * cand * h * 4 <= budget:
            return cand
    return 8


def policy_head_kernel(feat_ref, pb_ref, embh_ref, w1af_ref, w2a_ref, b2a_ref,
                       out_ref, *, cn):
    BT = feat_ref.shape[0]
    Npad, H = embh_ref.shape

    # ---- actor first layer, feature part: single (BT,F)@(F,H) MXU matmul ----
    feat_h = jnp.dot(feat_ref[...], w1af_ref[...],
                     preferred_element_type=jnp.float32)            # (BT, H)
    feat_h3 = feat_h[:, None, :]                                    # (BT, 1, H)
    w2a3 = w2a_ref[...].reshape(1, 1, H)                            # hoisted

    # ---- fused per-candidate-chunk: add + leaky + (*w2a) + H-reduce ----
    parts = []
    for c in range(Npad // cn):
        embh_c = embh_ref[c * cn:(c + 1) * cn, :]                   # (cn, H) static slice
        h = _leaky_relu(feat_h3 + embh_c[None, :, :])               # (BT, cn, H)
        parts.append(jnp.sum(h * w2a3, axis=-1))                    # (BT, cn)
    logits = jnp.concatenate(parts, axis=-1) + b2a_ref[...]         # (BT, Npad)

    # ---- validity mask + exact softmax over the candidate (lane) axis ----
    idxf = (jax.lax.broadcasted_iota(jnp.int32, (BT, Npad), 1)
            .astype(jnp.float32) + 1.0)
    pb = pb_ref[...]                                                # (BT, 2)
    prev = pb[:, 0:1]                                               # prev + prev_unmod
    basis = pb[:, 1:2]                                              # basis_dim
    valid = ((idxf >= prev + 1.0) & (idxf <= basis)) | (idxf == 1.0)
    # large finite sentinel; idx==1 is always valid so the row max stays finite
    masked = jnp.where(valid, logits, -1e30)

    m = jnp.max(masked, axis=-1, keepdims=True)
    e = jnp.exp(masked - m)
    s = jnp.sum(e, axis=-1, keepdims=True)
    out_ref[...] = e / s            # exact divide -> rows sum to 1 in f32


def joint_energy_policy_head(features, previous_action, basis_dim,
                             previous_action_unmodified, params, *, max_basis_dim):
    """max_basis_dim: static python int == basis_dim.max() (no device sync).
    Candidates beyond a row's basis_dim get zero probability."""
    B, F = features.shape
    H = params["w1af"].shape[1]

    N = int(max_basis_dim)
    Npad = _round_up(max(N, 1), 128)            # candidates padded to lane width
    BT = min(_round_up(B, 8), 128)              # batch rows per grid step
    B_pad = _round_up(B, BT)
    CN = _pick_chunk(Npad, BT, H)

    # ---- batch-invariant index-embedding path precomputed in plain XLA ----
    idxs = jnp.arange(1, Npad + 1, dtype=jnp.float32)[:, None]           # (Npad, 1)
    e1 = _leaky_relu(idxs * params["w1e"] + params["b1e"])               # (Npad, E)
    emb = e1 @ params["w2e_t"] + params["b2e"]                           # (Npad, E)
    embh = (emb @ params["w1ae"] + params["b1a"]).astype(jnp.float32)    # (Npad, H)

    pad_rows = lambda x: jnp.pad(x, ((0, B_pad - B),) + ((0, 0),) * (x.ndim - 1))
    feats = pad_rows(features.astype(jnp.float32))                       # (B_pad, F)
    prev = (previous_action + previous_action_unmodified).astype(jnp.float32)
    pb = pad_rows(jnp.stack([prev, basis_dim.astype(jnp.float32)], axis=1))  # (B_pad, 2)

    kernel = functools.partial(policy_head_kernel, cn=CN)

    out = pl.pallas_call(
        kernel,
        out_shape=jax.ShapeDtypeStruct((B_pad, Npad), jnp.float32),
        grid=(B_pad // BT,),
        in_specs=[
            pl.BlockSpec((BT, F), lambda i: (i, 0)),       # features tile
            pl.BlockSpec((BT, 2), lambda i: (i, 0)),       # [prev+prev_unmod, basis]
            pl.BlockSpec((Npad, H), lambda i: (0, 0)),     # precomputed emb@W1a_e + b1a
            pl.BlockSpec((F, H), lambda i: (0, 0)),        # actor W1 (feature part, T)
            pl.BlockSpec((1, H), lambda i: (0, 0)),        # actor W2 as a row vector
            pl.BlockSpec((1, 1), lambda i: (0, 0)),        # actor b2
        ],
        out_specs=pl.BlockSpec((BT, Npad), lambda i: (i, 0)),
        compiler_params=pltpu.CompilerParams(
            # no cross-step state -> safe to shard across TensorCores (v7x)
            dimension_semantics=("parallel",)),
    )(feats, pb, embh, params["w1af"], params["w2a_row"], params["b2a"])

    return out[:B, :N]                                     # (B, N) probs


def init_params(key, feature_dim, hidden_dim, index_embedding_dim):
    """Deterministic init matching the nn.Linear shapes (U(-1/sqrt(fan_in), ...))."""
    F, H, E = feature_dim, hidden_dim, index_embedding_dim
    ks = jax.random.split(key, 8)
    u = lambda k, shape, fan_in: jax.random.uniform(
        k, shape, jnp.float32, -1.0 / jnp.sqrt(fan_in), 1.0 / jnp.sqrt(fan_in))
    # index_embedding: Linear(1, E), Linear(E, E)
    w1e = u(ks[0], (1, E), 1.0)                 # weight (E,1) stored as row vector
    b1e = u(ks[1], (1, E), 1.0)
    w2e_t = u(ks[2], (E, E), float(E))          # weight (E,E) pre-transposed
    b2e = u(ks[3], (1, E), float(E))
    # actor: Linear(F+E, H), Linear(H, 1)
    w1a_t = u(ks[4], (F + E, H), float(F + E))  # weight (H, F+E) pre-transposed
    b1a = u(ks[5], (1, H), float(F + E))
    w2a_row = u(ks[6], (1, H), float(H))        # weight (1, H) as a row vector
    b2a = u(ks[7], (1, 1), float(H))
    return {
        "w1e": w1e, "b1e": b1e, "w2e_t": w2e_t, "b2e": b2e,
        "w1af": w1a_t[:F, :], "w1ae": w1a_t[F:, :], "b1a": b1a,
        "w2a_row": w2a_row, "b2a": b2a,
    }


def reference_forward(features, previous_action, basis_dim,
                      previous_action_unmodified, params, *, max_basis_dim):
    """Pure-JAX mirror of the PyTorch forward (eval mode)."""
    B, F = features.shape
    N = int(max_basis_dim)
    indices = jnp.broadcast_to(jnp.arange(1, N + 1, dtype=jnp.float32)[None, :], (B, N))
    x = indices[..., None]                                           # (B, N, 1)
    e1 = _leaky_relu(x * params["w1e"][0] + params["b1e"][0])        # (B, N, E)
    emb = e1 @ params["w2e_t"] + params["b2e"][0]                    # (B, N, E)
    feat_rep = jnp.broadcast_to(features[:, None, :], (B, N, F))
    h = _leaky_relu(feat_rep @ params["w1af"] + emb @ params["w1ae"] + params["b1a"][0])
    logits = jnp.einsum("bnh,h->bn", h, params["w2a_row"][0]) + params["b2a"][0, 0]
    prev = (previous_action + previous_action_unmodified)[:, None]
    bd = basis_dim.astype(jnp.float32)[:, None]
    valid = ((indices >= prev + 1.0) & (indices <= bd)) | (indices == 1.0)
    masked = jnp.where(valid, logits, -jnp.inf)
    return jax.nn.softmax(masked, axis=-1)


if __name__ == "__main__":
    feature_dim, hidden_dim, index_embedding_dim = 32, 128, 32
    B = 2

    key = jax.random.PRNGKey(0)
    k_params, k_feat = jax.random.split(key)
    params = init_params(k_params, feature_dim, hidden_dim, index_embedding_dim)

    features = jax.random.normal(k_feat, (B, feature_dim), jnp.float32)
    previous_action = jnp.array([1.0, 2.0], jnp.float32)
    previous_action_unmodified = jnp.array([0.0, 1.0], jnp.float32)
    basis_dim = jnp.array([5, 8], jnp.int32)
    MAX_BASIS = 8   # static candidate count == basis_dim.max(); no device sync

    probs = joint_energy_policy_head(features, previous_action, basis_dim,
                                     previous_action_unmodified, params,
                                     max_basis_dim=MAX_BASIS)
    probs = jax.block_until_ready(probs)

    ref = reference_forward(features, previous_action, basis_dim,
                            previous_action_unmodified, params,
                            max_basis_dim=MAX_BASIS)
    assert probs.shape == ref.shape
    assert bool(jnp.all(jnp.isfinite(probs)))
    # tolerance covers default (non-highest) matmul precision on real MXUs
    assert jnp.allclose(probs, ref, atol=2e-3, rtol=2e-3), (probs, ref)
    # exact-divide softmax: rows sum to 1 up to f32 rounding
    assert jnp.allclose(jnp.sum(probs, axis=-1), 1.0, atol=1e-4)

    print("KERNEL_OK")
</pallas_src>

<mosaic_0001>
module attributes {stable_mosaic.version = 11 : i64} {
  func.func @policy_head_kernel(%arg0: i32, %arg1: memref<8x32xf32, #tpu.memory_space<vmem>>, %arg2: memref<8x2xf32, #tpu.memory_space<vmem>>, %arg3: memref<128x128xf32, #tpu.memory_space<vmem>>, %arg4: memref<32x128xf32, #tpu.memory_space<vmem>>, %arg5: memref<1x128xf32, #tpu.memory_space<vmem>>, %arg6: memref<1x1xf32, #tpu.memory_space<vmem>>, %arg7: memref<8x128xf32, #tpu.memory_space<vmem>>) attributes {dimension_semantics = [#tpu.dimension_semantics<parallel>], iteration_bounds = array<i64: 1>, scalar_prefetch = 0 : i64, scratch_operands = 0 : i64, tpu.core_type = #tpu.core_type<tc>, window_params = [{transform_indices = @transform_0, window_bounds = array<i64: 8, 32>}, {transform_indices = @transform_1, window_bounds = array<i64: 8, 2>}, {pipeline_mode = #tpu.pipeline_mode<synchronous>, transform_indices = @transform_2, window_bounds = array<i64: 128, 128>}, {pipeline_mode = #tpu.pipeline_mode<synchronous>, transform_indices = @transform_3, window_bounds = array<i64: 32, 128>}, {pipeline_mode = #tpu.pipeline_mode<synchronous>, transform_indices = @transform_4, window_bounds = array<i64: 1, 128>}, {pipeline_mode = #tpu.pipeline_mode<synchronous>, transform_indices = @transform_5, window_bounds = array<i64: 1, 1>}, {transform_indices = @transform_6, window_bounds = array<i64: 8, 128>}]} {
    %c0 = arith.constant 0 : index
    %c0_0 = arith.constant 0 : index
    %0 = vector.load %arg1[%c0, %c0_0] : memref<8x32xf32, #tpu.memory_space<vmem>>, vector<8x32xf32>
    %c0_1 = arith.constant 0 : index
    %c0_2 = arith.constant 0 : index
    %1 = vector.load %arg4[%c0_1, %c0_2] : memref<32x128xf32, #tpu.memory_space<vmem>>, vector<32x128xf32>
    %cst = arith.constant dense<0.000000e+00> : vector<8x128xf32>
    %2 = tpu.matmul %0, %1, %cst {dimension_numbers = #tpu.dot_dimension_numbers<[1], [0], [0], [1], [0, 0, 1, 1], [], []>} : vector<8x32xf32>, vector<32x128xf32>, vector<8x128xf32> -> vector<8x128xf32>
    %3 = vector.shape_cast %2 : vector<8x128xf32> to vector<8x1x128xf32>
    %c0_3 = arith.constant 0 : index
    %c0_4 = arith.constant 0 : index
    %4 = vector.load %arg5[%c0_3, %c0_4] : memref<1x128xf32, #tpu.memory_space<vmem>>, vector<1x128xf32>
    %5 = vector.shape_cast %4 : vector<1x128xf32> to vector<1x1x128xf32>
    %c0_5 = arith.constant 0 : index
    %c0_6 = arith.constant 0 : index
    %6 = vector.load %arg3[%c0_5, %c0_6] : memref<128x128xf32, #tpu.memory_space<vmem>>, vector<32x128xf32>
    %7 = vector.shape_cast %6 : vector<32x128xf32> to vector<1x32x128xf32>
    %8 = vector.broadcast %3 : vector<8x1x128xf32> to vector<8x32x128xf32>
    %9 = vector.broadcast %7 : vector<1x32x128xf32> to vector<8x32x128xf32>
    %10 = arith.addf %8, %9 : vector<8x32x128xf32>
    %cst_7 = arith.constant 0.000000e+00 : f32
    %11 = vector.broadcast %cst_7 : f32 to vector<8x32x128xf32>
    %12 = arith.cmpf oge, %10, %11 : vector<8x32x128xf32>
    %cst_8 = arith.constant 0.00999999977 : f32
    %13 = vector.broadcast %cst_8 : f32 to vector<8x32x128xf32>
    %14 = arith.mulf %13, %10 : vector<8x32x128xf32>
    %15 = arith.select %12, %10, %14 : vector<8x32x128xi1>, vector<8x32x128xf32>
    %16 = vector.broadcast %5 : vector<1x1x128xf32> to vector<8x32x128xf32>
    %17 = arith.mulf %15, %16 : vector<8x32x128xf32>
    %cst_9 = arith.constant dense<0.000000e+00> : vector<8x32xf32>
    %18 = vector.multi_reduction <add>, %17, %cst_9 [2] : vector<8x32x128xf32> to vector<8x32xf32>
    %c32 = arith.constant 32 : index
    %c0_10 = arith.constant 0 : index
    %19 = vector.load %arg3[%c32, %c0_10] : memref<128x128xf32, #tpu.memory_space<vmem>>, vector<32x128xf32>
    %20 = vector.shape_cast %19 : vector<32x128xf32> to vector<1x32x128xf32>
    %21 = vector.broadcast %3 : vector<8x1x128xf32> to vector<8x32x128xf32>
    %22 = vector.broadcast %20 : vector<1x32x128xf32> to vector<8x32x128xf32>
    %23 = arith.addf %21, %22 : vector<8x32x128xf32>
    %cst_11 = arith.constant 0.000000e+00 : f32
    %24 = vector.broadcast %cst_11 : f32 to vector<8x32x128xf32>
    %25 = arith.cmpf oge, %23, %24 : vector<8x32x128xf32>
    %cst_12 = arith.constant 0.00999999977 : f32
    %26 = vector.broadcast %cst_12 : f32 to vector<8x32x128xf32>
    %27 = arith.mulf %26, %23 : vector<8x32x128xf32>
    %28 = arith.select %25, %23, %27 : vector<8x32x128xi1>, vector<8x32x128xf32>
    %29 = vector.broadcast %5 : vector<1x1x128xf32> to vector<8x32x128xf32>
    %30 = arith.mulf %28, %29 : vector<8x32x128xf32>
    %cst_13 = arith.constant dense<0.000000e+00> : vector<8x32xf32>
    %31 = vector.multi_reduction <add>, %30, %cst_13 [2] : vector<8x32x128xf32> to vector<8x32xf32>
    %c64 = arith.constant 64 : index
    %c0_14 = arith.constant 0 : index
    %32 = vector.load %arg3[%c64, %c0_14] : memref<128x128xf32, #tpu.memory_space<vmem>>, vector<32x128xf32>
    %33 = vector.shape_cast %32 : vector<32x128xf32> to vector<1x32x128xf32>
    %34 = vector.broadcast %3 : vector<8x1x128xf32> to vector<8x32x128xf32>
    %35 = vector.broadcast %33 : vector<1x32x128xf32> to vector<8x32x128xf32>
    %36 = arith.addf %34, %35 : vector<8x32x128xf32>
    %cst_15 = arith.constant 0.000000e+00 : f32
    %37 = vector.broadcast %cst_15 : f32 to vector<8x32x128xf32>
    %38 = arith.cmpf oge, %36, %37 : vector<8x32x128xf32>
    %cst_16 = arith.constant 0.00999999977 : f32
    %39 = vector.broadcast %cst_16 : f32 to vector<8x32x128xf32>
    %40 = arith.mulf %39, %36 : vector<8x32x128xf32>
    %41 = arith.select %38, %36, %40 : vector<8x32x128xi1>, vector<8x32x128xf32>
    %42 = vector.broadcast %5 : vector<1x1x128xf32> to vector<8x32x128xf32>
    %43 = arith.mulf %41, %42 : vector<8x32x128xf32>
    %cst_17 = arith.constant dense<0.000000e+00> : vector<8x32xf32>
    %44 = vector.multi_reduction <add>, %43, %cst_17 [2] : vector<8x32x128xf32> to vector<8x32xf32>
    %c96 = arith.constant 96 : index
    %c0_18 = arith.constant 0 : index
    %45 = vector.load %arg3[%c96, %c0_18] : memref<128x128xf32, #tpu.memory_space<vmem>>, vector<32x128xf32>
    %46 = vector.shape_cast %45 : vector<32x128xf32> to vector<1x32x128xf32>
    %47 = vector.broadcast %3 : vector<8x1x128xf32> to vector<8x32x128xf32>
    %48 = vector.broadcast %46 : vector<1x32x128xf32> to vector<8x32x128xf32>
    %49 = arith.addf %47, %48 : vector<8x32x128xf32>
    %cst_19 = arith.constant 0.000000e+00 : f32
    %50 = vector.broadcast %cst_19 : f32 to vector<8x32x128xf32>
    %51 = arith.cmpf oge, %49, %50 : vector<8x32x128xf32>
    %cst_20 = arith.constant 0.00999999977 : f32
    %52 = vector.broadcast %cst_20 : f32 to vector<8x32x128xf32>
    %53 = arith.mulf %52, %49 : vector<8x32x128xf32>
    %54 = arith.select %51, %49, %53 : vector<8x32x128xi1>, vector<8x32x128xf32>
    %55 = vector.broadcast %5 : vector<1x1x128xf32> to vector<8x32x128xf32>
    %56 = arith.mulf %54, %55 : vector<8x32x128xf32>
    %cst_21 = arith.constant dense<0.000000e+00> : vector<8x32xf32>
    %57 = vector.multi_reduction <add>, %56, %cst_21 [2] : vector<8x32x128xf32> to vector<8x32xf32>
    %58 = tpu.concatenate %18, %31, %44, %57 in 1 : vector<8x32xf32>, vector<8x32xf32>, vector<8x32xf32>, vector<8x32xf32> -> vector<8x128xf32>
    %c0_22 = arith.constant 0 : index
    %c0_23 = arith.constant 0 : index
    %59 = vector.load %arg6[%c0_22, %c0_23] : memref<1x1xf32, #tpu.memory_space<vmem>>, vector<1x1xf32>
    %60 = vector.broadcast %59 : vector<1x1xf32> to vector<8x128xf32>
    %61 = arith.addf %58, %60 : vector<8x128xf32>
    %62 = tpu.iota {dimensions = array<i32: 1>} : vector<8x128xi32>
    %63 = arith.sitofp %62 : vector<8x128xi32> to vector<8x128xf32>
    %cst_24 = arith.constant 1.000000e+00 : f32
    %64 = vector.broadcast %cst_24 : f32 to vector<8x128xf32>
    %65 = arith.addf %63, %64 : vector<8x128xf32>
    %c0_25 = arith.constant 0 : index
    %c0_26 = arith.constant 0 : index
    %66 = vector.load %arg2[%c0_25, %c0_26] : memref<8x2xf32, #tpu.memory_space<vmem>>, vector<8x2xf32>
    %67 = vector.extract_strided_slice %66 {offsets = [0, 0], sizes = [8, 1], strides = [1, 1]} : vector<8x2xf32> to vector<8x1xf32>
    %68 = vector.extract_strided_slice %66 {offsets = [0, 1], sizes = [8, 1], strides = [1, 1]} : vector<8x2xf32> to vector<8x1xf32>
    %cst_27 = arith.constant 1.000000e+00 : f32
    %69 = vector.broadcast %cst_27 : f32 to vector<8x1xf32>
    %70 = arith.addf %67, %69 : vector<8x1xf32>
    %71 = vector.broadcast %70 : vector<8x1xf32> to vector<8x128xf32>
    %72 = arith.cmpf oge, %65, %71 : vector<8x128xf32>
    %73 = vector.broadcast %68 : vector<8x1xf32> to vector<8x128xf32>
    %74 = arith.cmpf ole, %65, %73 : vector<8x128xf32>
    %75 = arith.andi %72, %74 : vector<8x128xi1>
    %cst_28 = arith.constant 1.000000e+00 : f32
    %76 = vector.broadcast %cst_28 : f32 to vector<8x128xf32>
    %77 = arith.cmpf oeq, %65, %76 : vector<8x128xf32>
    %78 = arith.ori %75, %77 : vector<8x128xi1>
    %cst_29 = arith.constant -1.000000e+30 : f32
    %79 = vector.broadcast %cst_29 : f32 to vector<8x128xf32>
    %80 = arith.select %78, %61, %79 : vector<8x128xi1>, vector<8x128xf32>
    %cst_30 = arith.constant dense<0xFF800000> : vector<8xf32>
    %81 = vector.multi_reduction <maximumf>, %80, %cst_30 [1] : vector<8x128xf32> to vector<8xf32>
    %82 = vector.shape_cast %81 : vector<8xf32> to vector<8x1xf32>
    %83 = vector.broadcast %82 : vector<8x1xf32> to vector<8x128xf32>
    %84 = arith.subf %80, %83 : vector<8x128xf32>
    %85 = math.exp %84 : vector<8x128xf32>
    %cst_31 = arith.constant dense<0.000000e+00> : vector<8xf32>
    %86 = vector.multi_reduction <add>, %85, %cst_31 [1] : vector<8x128xf32> to vector<8xf32>
    %87 = vector.shape_cast %86 : vector<8xf32> to vector<8x1xf32>
    %88 = vector.broadcast %87 : vector<8x1xf32> to vector<8x128xf32>
    %89 = arith.divf %85, %88 : vector<8x128xf32>
    %c0_32 = arith.constant 0 : index
    %c0_33 = arith.constant 0 : index
    %90 = vector.load %arg7[%c0_32, %c0_33] : memref<8x128xf32, #tpu.memory_space<vmem>>, vector<8x128xf32>
    tpu.vector_store %arg7[%c0_32, %c0_33], %89 {strides = array<i32>} : memref<8x128xf32, #tpu.memory_space<vmem>>, vector<8x128xf32>,
    return
  }
  func.func @transform_0(%arg0: i32) -> (i32, i32) {
    %c0_i32 = arith.constant 0 : i32
    %c0_i32_0 = arith.constant 0 : i32
    return %arg0, %c0_i32 : i32, i32
  }
  func.func @transform_1(%arg0: i32) -> (i32, i32) {
    %c0_i32 = arith.constant 0 : i32
    %c0_i32_0 = arith.constant 0 : i32
    return %arg0, %c0_i32 : i32, i32
  }
  func.func @transform_2(%arg0: i32) -> (i32, i32) {
    %c0_i32 = arith.constant 0 : i32
    %c0_i32_0 = arith.constant 0 : i32
    %c0_i32_1 = arith.constant 0 : i32
    return %c0_i32, %c0_i32_0 : i32, i32
  }
  func.func @transform_3(%arg0: i32) -> (i32, i32) {
    %c0_i32 = arith.constant 0 : i32
    %c0_i32_0 = arith.constant 0 : i32
    %c0_i32_1 = arith.constant 0 : i32
    return %c0_i32, %c0_i32_0 : i32, i32
  }
  func.func @transform_4(%arg0: i32) -> (i32, i32) {
    %c0_i32 = arith.constant 0 : i32
    %c0_i32_0 = arith.constant 0 : i32
    %c0_i32_1 = arith.constant 0 : i32
    return %c0_i32, %c0_i32_0 : i32, i32
  }
  func.func @transform_5(%arg0: i32) -> (i32, i32) {
    %c0_i32 = arith.constant 0 : i32
    %c0_i32_0 = arith.constant 0 : i32
    %c0_i32_1 = arith.constant 0 : i32
    return %c0_i32, %c0_i32_0 : i32, i32
  }
  func.func @transform_6(%arg0: i32) -> (i32, i32) {
    %c0_i32 = arith.constant 0 : i32
    %c0_i32_0 = arith.constant 0 : i32
    return %arg0, %c0_i32 : i32, i32
  }
}

</mosaic_0001>

<bundles_post_ra>
// kernel: tpu_custom_call.1
= control target key start
LH: loop header
LB: loop body
LE: loop exit
PB: predicated region body
PF: predicated region fallthrough
CT: control target
= control target key end

     0   :  { %s3173_s0 = inlined_call_operand.vmem [shape: f32[8,32], index: 0, kind: input, shape index: {}]   ;;  %s3174_s1 = inlined_call_operand.vmem [shape: f32[8,2], index: 1, kind: input, shape index: {}]   ;;  %s3175_s2 = inlined_call_operand.hbm [shape: f32[128,128], index: 2, kind: input, shape index: {}]   ;;  %s3176_s3 = inlined_call_operand.hbm [shape: f32[32,128], index: 3, kind: input, shape index: {}]   ;;  %s3177_s4 = inlined_call_operand.vmem [shape: f32[1,128], index: 4, kind: input, shape index: {}]   ;;  %s3178_s5 = inlined_call_operand.<no memory space> [shape: f32[1,1], index: 5, kind: input, shape index: {}]   ;;  %s3179_s6 = inlined_call_operand.hbm [shape: f32[8,128], index: 6, kind: output, shape index: {}]  }
   0x1   :  { %v11_v0 = vstv %s3178_s5 }
   0x2   :  { %12 = vst [vmem:[#allocation2] sm:$0x1] %v11_v0 }
   0x3   :  { %13 = vsyncpa [#allocation4], 0 }
   0x4   :  { %14 = vsyncpa [#allocation7], 0 }
   0x5   :  { %15 = vsyncpa [#allocation5], 0  ;;  %s2141_s23 = smov [#allocation3]   ;;  %s2069_s27 = scalar_lea.hbm %s3175_s2, 2048 }
   0x6   :  { %s25_s24 = sshll.u32 %s2141_s23, 4  ;;  %p2070_p0 = scmp.ne.s32.totalorder %s3175_s2, %s2069_s27  ;;  %s26_s24 = int_to_ptr.vmem [resolvable:$true] %s25_s24 }
   0x7   :  { %p2073_p1 = scmp.lt.u32.totalorder %s2069_s27, %s3175_s2 }
   0x9   :  { %p2075_p2 = pnand %p2073_p1, %p2070_p0 }
   0xb   :  { %2078 = shalt.err (!%p2075_p2)
}
   0xc   :  { %s2079_s5 = scalar_lea.vmem %s26_s24, 2048  ;;  %p2084_p4 = scmp.lt.s32.totalorder %s26_s24, %s26_s24 }
   0xd   :  { %p2080_p3 = scmp.ne.s32.totalorder %s26_s24, %s2079_s5  ;;  %p2085_p5 = scmp.lt.s32.totalorder %s2079_s5, %s2079_s5 }
   0xf   :  { %p2086_p6 = por %p2085_p5, %p2084_p4 }
  0x11   :  { %p2087_p7 = pnand %p2086_p6, %p2080_p3 }
  0x13   :  { %2090 = shalt.err (!%p2087_p7)
}
  0x14   :  { %s2142_s8 = smov 128   ;;  %s2143_s9 = smov 8  }
  0x15   :  { %31 = dma.hbm_to_vmem [thread:$0]  %s3175_s2, 2048, %s26_s24, [#allocation4], %s2142_s8, %s2142_s8, %s2143_s9  }
  0x16   :  { %s2144_s12 = smov [#allocation6]   ;;  %s2091_s16 = scalar_lea.hbm %s3176_s3, 512 }
  0x17   :  { %s37_s13 = sshll.u32 %s2144_s12, 4  ;;  %p2092_p8 = scmp.ne.s32.totalorder %s3176_s3, %s2091_s16  ;;  %s38_s13 = int_to_ptr.vmem [resolvable:$true] %s37_s13 }
  0x18   :  { %p2095_p9 = scmp.lt.u32.totalorder %s2091_s16, %s3176_s3 }
  0x1a   :  { %p2097_p10 = pnand %p2095_p9, %p2092_p8 }
  0x1c   :  { %2100 = shalt.err (!%p2097_p10)
}
  0x1d   :  { %s2101_s21 = scalar_lea.vmem %s38_s13, 512  ;;  %p2106_p12 = scmp.lt.s32.totalorder %s38_s13, %s38_s13 }
  0x1e   :  { %p2102_p11 = scmp.ne.s32.totalorder %s38_s13, %s2101_s21  ;;  %p2107_p13 = scmp.lt.s32.totalorder %s2101_s21, %s2101_s21 }
  0x20   :  { %p2108_p0 = por %p2107_p13, %p2106_p12 }
  0x22   :  { %p2109_p1 = pnand %p2108_p0, %p2102_p11 }
  0x24   :  { %2112 = shalt.err (!%p2109_p1)
}
  0x25   :  { %43 = dma.hbm_to_vmem [thread:$0]  %s3176_s3, 512, %s38_s13, [#allocation7], %s2142_s8, %s2142_s8, %s2143_s9  }
  0x26   :  { %2135 = dma.done.wait [#allocation4], 2048  }
  0x27   :  { %2136 = vsyncadd [#allocation4], 4294965248 }
  0x28   :  { %2137 = dma.done.wait [#allocation7], 512  }
  0x29   :  { %2138 = vsyncadd [#allocation7], 4294966784  ;;  %v2145_v1 = vmov 0.0|0.0   ;;  %vm2146_vm0 = vmmov 0   ;;  %v2147_v2 = vmov 0.0   ;;  %v55_v3 = vld [vmem:[#allocation6] sm:$0xff]  ;;  %v138_v12 = vlaneseq }
  0x2a   :  { %2027 = vmatprep.subr.bf16.mxu0 %v2145_v1  ;;  %2024 = vmatprep.mubr.msk.f32.mxu0 %vm2146_vm0, %v2147_v2  ;;  %v56_v4 = vld [vmem:[#allocation6 + $0x8] sm:$0xff]  ;;  %v57_v6 = vld [vmem:[#allocation6 + $0x10] sm:$0xff]  ;;  %v58_v7 = vld [vmem:[#allocation6 + $0x18] sm:$0xff]  ;;  %vm3180_vm1 = vcmask 261120   ;;  %v2148_v10 = vmov 1966171168  }
  0x2b   :  { %v2028_v5 = vpack.c.bf16 %v56_v4, %v55_v3  ;;  %v2031_v8 = vpack.c.bf16 %v58_v7, %v57_v6  ;;  %v54_v9 = vld [vmem:[%s3173_s0] sm:$0xff]  ;;  %v136_v11 = vunpack.c.l.s4 %v2148_v10  ;;  %v2219_v14 = vshrl.u32 %v138_v12, 7  ;;  %v2231_v27 = vld [vmem:[#allocation3 + $0x10] sm:$0xff]  ;;  %v2249_v36 = vld [vmem:[#allocation3 + $0x8] sm:$0xff] }
  0x2c   :  { %v2233_v28 = vld [vmem:[#allocation3] sm:$0xff]  ;;  %v2247_v35 = vld [vmem:[#allocation3 + $0x18] sm:$0xff]  ;;  %v2267_v43 = vld [vmem:[#allocation3 + $0x28] sm:$0xff] }
  0x2d   :  { %2029 = vmatpush3.bf16.msra.mxu0 %v2028_v5  ;;  %v137_v13 = vunpack.c.0.s8 %v136_v11  ;;  %v2223_v20 = vsub.s32 0, %v2219_v14  ;;  %v2251_v37 = vld [vmem:[#allocation3 + $0x20] sm:$0xff]  ;;  %v2256_v38 = vld [vmem:[%s3177_s4] ss:$0 sm:$0xff]  ;;  %v2269_v44 = vld [vmem:[#allocation3 + $0x30] sm:$0xff] }
  0x2e   :  { %2030 = vmatprep.subr.bf16.mxu0 %v2145_v1  ;;  %v2286_v58 = vld [vmem:[#allocation3 + $0x48] sm:$0xff]  ;;  %v2288_v63 = vld [vmem:[#allocation3 + $0x40] sm:$0xff]  ;;  %v2290_v0 = vld [vmem:[#allocation3 + $0x50] sm:$0xff] }
  0x2f   :  { %v140_v15 = vsub.s32 %v137_v13, %v2219_v14  ;;  %v2300_v10 = vld [vmem:[#allocation3 + $0x38] sm:$0xff]  ;;  %v2302_v13 = vld [vmem:[#allocation3 + $0x60] sm:$0xff] }
  0x31   :  { %2032 = vmatpush3.bf16.msra.mxu0 %v2031_v8 }
  0x34   :  { %2025 = vmatmul.mubr.msk.f32.vlgmr.msra.gmra.mrb[0].mxu0 %vm3180_vm1, %v54_v9 }
 0x107   :  { %v129_v16 = vpop.f32.mrb[0].mxu0 }
 0x108   :  { %v134_v17 = vcombine.high %v129_v16, %v129_v16  ;;  %v141_v18 = vrot.slane %v129_v16, %v140_v15  ;;  %v2026_v19 = vpop.f32.mrb[1].mxu0 }
 0x10a   :  { %v148_v21 = vrot.slane %v134_v17, %v140_v15  ;;  %v149_v22 = vcombine.high %v141_v18, %v141_v18  ;;  %v2225_v23 = vrot.slane %v141_v18, %v140_v15 }
 0x10c   :  { %v150_v24 = vcombine.high %v148_v21, %v148_v21  ;;  %v2227_v25 = vrot.slane %v148_v21, %v140_v15  ;;  %v2229_v26 = vrot.slane %v149_v22, %v140_v15  ;;  %v2237_v29 = vrot.slane %v2225_v23, %v2223_v20 }
 0x10e   :  { %v178_v30 = vrot.slane %v150_v24, %v140_v15  ;;  %v180_v31 = vcombine.high %v2227_v25, %v2227_v25  ;;  %v181_v32 = vcombine.high %v2229_v26, %v2229_v26  ;;  %v230_v33 = vadd.f32 %v2237_v29, %v2231_v27 }
 0x10f   :  { %v228_v34 = vadd.f32 %v2237_v29, %v2233_v28  ;;  %v231_v48 = vadd.f32 %v2237_v29, %v2247_v35  ;;  %v229_v49 = vadd.f32 %v2237_v29, %v2249_v36  ;;  %v462_v50 = vadd.f32 %v2251_v37, %v2237_v29 }
 0x110   :  { %v182_v39 = vcombine.high %v178_v30, %v178_v30  ;;  %v2259_v40 = vrot.slane %v181_v32, %v2223_v20  ;;  %v2262_v41 = vrot.slane %v178_v30, %v2223_v20  ;;  %v2265_v42 = vrot.slane %v180_v31, %v2223_v20  ;;  %v2310_v30 = vld [vmem:[#allocation3 + $0x68] sm:$0xff]  ;;  %v2312_v31 = vld [vmem:[#allocation3 + $0x58] sm:$0xff] }
 0x111   :  { %vm262_vm2 = vcmp.ge.f32.partialorder %v230_v33, 0.0  ;;  %v294_v45 = vmul.f32 0.01, %v230_v33  ;;  %vm260_vm3 = vcmp.ge.f32.partialorder %v228_v34, 0.0  ;;  %v292_v46 = vmul.f32 0.01, %v228_v34 }
 0x112   :  { %v2272_v47 = vrot.slane %v182_v39, %v2223_v20  ;;  %v463_v53 = vadd.f32 %v2267_v43, %v2237_v29  ;;  %v464_v54 = vadd.f32 %v2269_v44, %v2237_v29  ;;  %vm263_vm4 = vcmp.ge.f32.partialorder %v231_v48, 0.0 }
 0x113   :  { %v326_v51 = vsel %vm262_vm2, %v230_v33, %v294_v45  ;;  %v324_v52 = vsel %vm260_vm3, %v228_v34, %v292_v46  ;;  %v295_v57 = vmul.f32 0.01, %v231_v48  ;;  %vm261_vm5 = vcmp.ge.f32.partialorder %v229_v49, 0.0 }
 0x114   :  { %v364_v55 = vmul.f32 %v2256_v38, %v326_v51  ;;  %v362_v56 = vmul.f32 %v2256_v38, %v324_v52  ;;  %v293_v59 = vmul.f32 0.01, %v229_v49  ;;  %vm494_vm6 = vcmp.ge.f32.partialorder %v462_v50, 0.0  ;;  %v2322_v51 = vld [vmem:[#allocation3 + $0x78] sm:$0xff] }
 0x115   :  { %v526_v60 = vmul.f32 0.01, %v462_v50  ;;  %v327_v61 = vsel %vm263_vm4, %v231_v48, %v295_v57  ;;  %vm495_vm7 = vcmp.ge.f32.partialorder %v463_v53, 0.0  ;;  %v527_v62 = vmul.f32 0.01, %v463_v53 }
 0x116   :  { %398 = vadd.xlane.f32.xlu1 %v364_v55  ;;  %394 = vadd.xlane.f32.xlu0 %v362_v56  ;;  %v365_v1 = vmul.f32 %v2256_v38, %v327_v61  ;;  %v325_v2 = vsel %vm261_vm5, %v229_v49, %v293_v59  ;;  %v528_v5 = vmul.f32 0.01, %v464_v54  ;;  %v691_v6 = vadd.f32 %v2286_v58, %v2237_v29 }
 0x117   :  { %v363_v3 = vmul.f32 %v2256_v38, %v325_v2  ;;  %v558_v4 = vsel %vm494_vm6, %v462_v50, %v526_v60  ;;  %v559_v7 = vsel %vm495_vm7, %v463_v53, %v527_v62  ;;  %vm496_vm8 = vcmp.ge.f32.partialorder %v464_v54, 0.0  ;;  %v2320_v50 = vld [vmem:[#allocation3 + $0x70] sm:$0xff] }
 0x118   :  { %v690_v8 = vadd.f32 %v2288_v63, %v2237_v29  ;;  %v692_v9 = vadd.f32 %v2290_v0, %v2237_v29  ;;  %vm723_vm9 = vcmp.ge.f32.partialorder %v691_v6, 0.0  ;;  %v755_v11 = vmul.f32 0.01, %v691_v6 }
 0x119   :  { %v590_v15 = vmul.f32 %v2256_v38, %v558_v4  ;;  %v591_v16 = vmul.f32 %v2256_v38, %v559_v7  ;;  %v560_v17 = vsel %vm496_vm8, %v464_v54, %v528_v5  ;;  %v465_v19 = vadd.f32 %v2300_v10, %v2237_v29 }
 0x11a   :  { %400 = vadd.xlane.f32.xlu1 %v365_v1  ;;  %396 = vadd.xlane.f32.xlu0 %v363_v3  ;;  %v754_v18 = vmul.f32 0.01, %v690_v8  ;;  %v787_v21 = vsel %vm723_vm9, %v691_v6, %v755_v11  ;;  %vm722_vm10 = vcmp.ge.f32.partialorder %v690_v8, 0.0  ;;  %v756_v22 = vmul.f32 0.01, %v692_v9 }
 0x11b   :  { %v918_v24 = vadd.f32 %v2302_v13, %v2237_v29  ;;  %vm724_vm11 = vcmp.ge.f32.partialorder %v692_v9, 0.0  ;;  %v592_v32 = vmul.f32 %v2256_v38, %v560_v17  ;;  %v819_v33 = vmul.f32 %v2256_v38, %v787_v21 }
 0x11c   :  { %v786_v34 = vsel %vm722_vm10, %v690_v8, %v754_v18  ;;  %v529_v39 = vmul.f32 0.01, %v465_v19  ;;  %v919_v45 = vadd.f32 %v2310_v30, %v2237_v29  ;;  %v788_v46 = vsel %vm724_vm11, %v692_v9, %v756_v22 }
 0x11d   :  { %vm497_vm12 = vcmp.ge.f32.partialorder %v465_v19, 0.0  ;;  %v982_v48 = vmul.f32 0.01, %v918_v24  ;;  %v693_v49 = vadd.f32 %v2312_v31, %v2237_v29  ;;  %vm950_vm13 = vcmp.ge.f32.partialorder %v918_v24, 0.0 }
 0x11e   :  { %622 = vadd.xlane.f32.xlu1 %v590_v15  ;;  %624 = vadd.xlane.f32.xlu0 %v591_v16  ;;  %v2326_v52 = vrot.slane %v2229_v26, %v2223_v20  ;;  %v818_v53 = vmul.f32 %v2256_v38, %v786_v34  ;;  %v820_v54 = vmul.f32 %v2256_v38, %v788_v46  ;;  %v983_v56 = vmul.f32 0.01, %v919_v45 }
 0x11f   :  { %v561_v55 = vsel %vm497_vm12, %v465_v19, %v529_v39  ;;  %v920_v57 = vadd.f32 %v2320_v50, %v2237_v29  ;;  %v1014_v59 = vsel %vm950_vm13, %v918_v24, %v982_v48  ;;  %vm951_vm14 = vcmp.ge.f32.partialorder %v919_v45, 0.0 }
 0x120   :  { %v757_v60 = vmul.f32 0.01, %v693_v49  ;;  %v921_v61 = vadd.f32 %v2322_v51, %v2237_v29  ;;  %vm725_vm15 = vcmp.ge.f32.partialorder %v693_v49, 0.0  ;;  %v179_v26 = vcombine.high %v2225_v23, %v2225_v23 }
 0x121   :  { %v593_v62 = vmul.f32 %v2256_v38, %v561_v55  ;;  %v1046_v1 = vmul.f32 %v2256_v38, %v1014_v59  ;;  %v1015_v2 = vsel %vm951_vm14, %v919_v45, %v983_v56  ;;  %v984_v3 = vmul.f32 0.01, %v920_v57 }
 0x122   :  { %626 = vadd.xlane.f32.xlu1 %v592_v32  ;;  %852 = vadd.xlane.f32.xlu0 %v819_v33  ;;  %v233_v4 = vadd.f32 %v2326_v52, %v2249_v36  ;;  %v789_v5 = vsel %vm725_vm15, %v693_v49, %v757_v60  ;;  %vm952_vm0 = vcmp.ge.f32.partialorder %v920_v57, 0.0  ;;  %v985_v6 = vmul.f32 0.01, %v921_v61 }
 0x123   :  { %v232_v29 = vadd.f32 %v2326_v52, %v2233_v28  ;;  %vm953_vm2 = vcmp.ge.f32.partialorder %v921_v61, 0.0  ;;  %v2343_v23 = vrot.slane %v179_v26, %v2223_v20  ;;  %v235_v7 = vadd.f32 %v2326_v52, %v2247_v35 }
 0x124   :  { %v1047_v8 = vmul.f32 %v2256_v38, %v1015_v2  ;;  %v821_v9 = vmul.f32 %v2256_v38, %v789_v5  ;;  %v1016_v11 = vsel %vm952_vm0, %v920_v57, %v984_v3  ;;  %v297_v15 = vmul.f32 0.01, %v233_v4 }
 0x125   :  { %v1017_v16 = vsel %vm953_vm2, %v921_v61, %v985_v6  ;;  %vm265_vm3 = vcmp.ge.f32.partialorder %v233_v4, 0.0  ;;  %v296_v17 = vmul.f32 0.01, %v232_v29  ;;  %v234_v18 = vadd.f32 %v2326_v52, %v2231_v27 }
 0x126   :  { %850 = vadd.xlane.f32.xlu1 %v818_v53  ;;  %854 = vadd.xlane.f32.xlu0 %v820_v54  ;;  %vm264_vm4 = vcmp.ge.f32.partialorder %v232_v29, 0.0  ;;  %v1048_v19 = vmul.f32 %v2256_v38, %v1016_v11  ;;  %v1049_v21 = vmul.f32 %v2256_v38, %v1017_v16  ;;  %v329_v22 = vsel %vm265_vm3, %v233_v4, %v297_v15 }
 0x127   :  { %v299_v24 = vmul.f32 0.01, %v235_v7  ;;  %v237_v32 = vadd.f32 %v2343_v23, %v2249_v36  ;;  %v328_v33 = vsel %vm264_vm4, %v232_v29, %v296_v17  ;;  %vm267_vm5 = vcmp.ge.f32.partialorder %v235_v7, 0.0 }
 0x128   :  { %v298_v34 = vmul.f32 0.01, %v234_v18  ;;  %v236_v39 = vadd.f32 %v2343_v23, %v2233_v28  ;;  %vm266_vm6 = vcmp.ge.f32.partialorder %v234_v18, 0.0  ;;  %v2359_v45 = vrot.slane %v2227_v25, %v2223_v20 }
 0x129   :  { %v367_v46 = vmul.f32 %v2256_v38, %v329_v22  ;;  %v366_v48 = vmul.f32 %v2256_v38, %v328_v33  ;;  %v331_v49 = vsel %vm267_vm5, %v235_v7, %v299_v24  ;;  %v301_v53 = vmul.f32 0.01, %v237_v32 }
 0x12a   :  { %628 = vadd.xlane.f32.xlu1 %v593_v62  ;;  %1078 = vadd.xlane.f32.xlu0 %v1046_v1  ;;  %v239_v54 = vadd.f32 %v2343_v23, %v2247_v35  ;;  %v330_v55 = vsel %vm266_vm6, %v234_v18, %v298_v34  ;;  %vm269_vm7 = vcmp.ge.f32.partialorder %v237_v32, 0.0  ;;  %v300_v56 = vmul.f32 0.01, %v236_v39 }
 0x12b   :  { %v238_v57 = vadd.f32 %v2343_v23, %v2231_v27  ;;  %vm268_vm8 = vcmp.ge.f32.partialorder %v236_v39, 0.0  ;;  %v369_v20 = vmul.f32 %v2256_v38, %v331_v49  ;;  %v368_v25 = vmul.f32 %v2256_v38, %v330_v55 }
 0x12c   :  { %v333_v59 = vsel %vm269_vm7, %v237_v32, %v301_v53  ;;  %vm271_vm9 = vcmp.ge.f32.partialorder %v239_v54, 0.0  ;;  %v303_v60 = vmul.f32 0.01, %v239_v54  ;;  %v332_v61 = vsel %vm268_vm8, %v236_v39, %v300_v56 }
 0x12d   :  { %v302_v26 = vmul.f32 0.01, %v238_v57  ;;  %v245_v62 = vadd.f32 %v2359_v45, %v2249_v36  ;;  %v244_v1 = vadd.f32 %v2359_v45, %v2233_v28  ;;  %vm270_vm10 = vcmp.ge.f32.partialorder %v238_v57, 0.0 }
 0x12e   :  { %1080 = vadd.xlane.f32.xlu1 %v1047_v8  ;;  %856 = vadd.xlane.f32.xlu0 %v821_v9  ;;  %v371_v2 = vmul.f32 %v2256_v38, %v333_v59  ;;  %v370_v3 = vmul.f32 %v2256_v38, %v332_v61  ;;  %v335_v4 = vsel %vm271_vm9, %v239_v54, %v303_v60 }
 0x12f   :  { %v247_v5 = vadd.f32 %v2359_v45, %v2247_v35  ;;  %v334_v6 = vsel %vm270_vm10, %v238_v57, %v302_v26  ;;  %v309_v29 = vmul.f32 0.01, %v245_v62  ;;  %v308_v7 = vmul.f32 0.01, %v244_v1 }
 0x130   :  { %v246_v8 = vadd.f32 %v2359_v45, %v2231_v27  ;;  %vm277_vm11 = vcmp.ge.f32.partialorder %v245_v62, 0.0  ;;  %vm276_vm12 = vcmp.ge.f32.partialorder %v244_v1, 0.0  ;;  %v373_v9 = vmul.f32 %v2256_v38, %v335_v4 }
 0x131   :  { %v372_v11 = vmul.f32 %v2256_v38, %v334_v6  ;;  %v311_v15 = vmul.f32 0.01, %v247_v5  ;;  %v466_v16 = vadd.f32 %v2251_v37, %v2326_v52  ;;  %v467_v17 = vadd.f32 %v2267_v43, %v2326_v52 }
 0x132   :  { %1082 = vadd.xlane.f32.xlu1 %v1048_v19  ;;  %1084 = vadd.xlane.f32.xlu0 %v1049_v21  ;;  %v341_v18 = vsel %vm277_vm11, %v245_v62, %v309_v29  ;;  %v340_v19 = vsel %vm276_vm12, %v244_v1, %v308_v7  ;;  %vm279_vm13 = vcmp.ge.f32.partialorder %v247_v5, 0.0  ;;  %v310_v21 = vmul.f32 0.01, %v246_v8 }
 0x133   :  { %vm278_vm14 = vcmp.ge.f32.partialorder %v246_v8, 0.0  ;;  %v470_v22 = vadd.f32 %v2251_v37, %v2343_v23  ;;  %v379_v24 = vmul.f32 %v2256_v38, %v341_v18  ;;  %v378_v32 = vmul.f32 %v2256_v38, %v340_v19 }
 0x134   :  { %v343_v33 = vsel %vm279_vm13, %v247_v5, %v311_v15  ;;  %v530_v34 = vmul.f32 0.01, %v466_v16  ;;  %v342_v39 = vsel %vm278_vm14, %v246_v8, %v310_v21  ;;  %vm498_vm15 = vcmp.ge.f32.partialorder %v466_v16, 0.0 }
 0x135   :  { %vm499_vm0 = vcmp.ge.f32.partialorder %v467_v17, 0.0  ;;  %v381_v49 = vmul.f32 %v2256_v38, %v343_v33  ;;  %v380_v53 = vmul.f32 %v2256_v38, %v342_v39  ;;  %vm502_vm2 = vcmp.ge.f32.partialorder %v470_v22, 0.0 }
 0x136   :  { %404 = vadd.xlane.f32.xlu1 %v367_v46  ;;  %402 = vadd.xlane.f32.xlu0 %v366_v48  ;;  %v531_v46 = vmul.f32 0.01, %v467_v17  ;;  %v468_v48 = vadd.f32 %v2269_v44, %v2326_v52  ;;  %v562_v54 = vsel %vm498_vm15, %v466_v16, %v530_v34  ;;  %v534_v55 = vmul.f32 0.01, %v470_v22 }
 0x137   :  { %v594_v59 = vmul.f32 %v2256_v38, %v562_v54  ;;  %v472_v26 = vadd.f32 %v2269_v44, %v2343_v23  ;;  %v696_v4 = vadd.f32 %v2290_v0, %v2326_v52  ;;  %v699_v18 = vadd.f32 %v2286_v58, %v2343_v23 }
 0x138   :  { %v563_v56 = vsel %vm499_vm0, %v467_v17, %v531_v46  ;;  %v532_v57 = vmul.f32 0.01, %v468_v48  ;;  %vm500_vm3 = vcmp.ge.f32.partialorder %v468_v48, 0.0  ;;  %v566_v61 = vsel %vm502_vm2, %v470_v22, %v534_v55 }
 0x139   :  { %v595_v60 = vmul.f32 %v2256_v38, %v563_v56  ;;  %v598_v5 = vmul.f32 %v2256_v38, %v566_v61  ;;  %vm504_vm6 = vcmp.ge.f32.partialorder %v472_v26, 0.0  ;;  %v536_v29 = vmul.f32 0.01, %v472_v26 }
 0x13a   :  { %408 = vadd.xlane.f32.xlu1 %v369_v20  ;;  %406 = vadd.xlane.f32.xlu0 %v368_v25  ;;  %v694_v20 = vadd.f32 %v2288_v63, %v2326_v52  ;;  %v471_v25 = vadd.f32 %v2267_v43, %v2343_v23  ;;  %v564_v62 = vsel %vm500_vm3, %v468_v48, %v532_v57  ;;  %v760_v21 = vmul.f32 0.01, %v696_v4 }
 0x13b   :  { %v596_v6 = vmul.f32 %v2256_v38, %v564_v62  ;;  %v568_v17 = vsel %vm504_vm6, %v472_v26, %v536_v29  ;;  %vm728_vm8 = vcmp.ge.f32.partialorder %v696_v4, 0.0  ;;  %v763_v34 = vmul.f32 0.01, %v699_v18 }
 0x13c   :  { %v758_v1 = vmul.f32 0.01, %v694_v20  ;;  %vm726_vm4 = vcmp.ge.f32.partialorder %v694_v20, 0.0  ;;  %vm503_vm5 = vcmp.ge.f32.partialorder %v471_v25, 0.0  ;;  %v923_v39 = vadd.f32 %v2310_v30, %v2326_v52 }
 0x13d   :  { %v922_v46 = vadd.f32 %v2302_v13, %v2326_v52  ;;  %v792_v48 = vsel %vm728_vm8, %v696_v4, %v760_v21  ;;  %vm731_vm10 = vcmp.ge.f32.partialorder %v699_v18, 0.0  ;;  %v479_v54 = vadd.f32 %v2267_v43, %v2359_v45 }
 0x13e   :  { %412 = vadd.xlane.f32.xlu1 %v371_v2  ;;  %410 = vadd.xlane.f32.xlu0 %v370_v3  ;;  %v535_v2 = vmul.f32 0.01, %v471_v25  ;;  %v695_v3 = vadd.f32 %v2286_v58, %v2326_v52  ;;  %v790_v7 = vsel %vm726_vm4, %v694_v20, %v758_v1  ;;  %v824_v55 = vmul.f32 %v2256_v38, %v792_v48 }
 0x13f   :  { %v822_v15 = vmul.f32 %v2256_v38, %v790_v7  ;;  %v795_v57 = vsel %vm731_vm10, %v699_v18, %v763_v34  ;;  %v987_v20 = vmul.f32 0.01, %v923_v39  ;;  %vm955_vm12 = vcmp.ge.f32.partialorder %v923_v39, 0.0 }
 0x140   :  { %v567_v8 = vsel %vm503_vm5, %v471_v25, %v535_v2  ;;  %vm727_vm7 = vcmp.ge.f32.partialorder %v695_v3, 0.0  ;;  %vm954_vm13 = vcmp.ge.f32.partialorder %v922_v46, 0.0  ;;  %v827_v61 = vmul.f32 %v2256_v38, %v795_v57 }
 0x141   :  { %v599_v16 = vmul.f32 %v2256_v38, %v567_v8  ;;  %v1019_v62 = vsel %vm955_vm12, %v923_v39, %v987_v20  ;;  %v543_v1 = vmul.f32 0.01, %v479_v54  ;;  %v697_v2 = vadd.f32 %v2312_v31, %v2326_v52 }
 0x142   :  { %416 = vadd.xlane.f32.xlu1 %v373_v9  ;;  %414 = vadd.xlane.f32.xlu0 %v372_v11  ;;  %v759_v9 = vmul.f32 0.01, %v695_v3  ;;  %v469_v11 = vadd.f32 %v2300_v10, %v2326_v52  ;;  %vm511_vm14 = vcmp.ge.f32.partialorder %v479_v54, 0.0  ;;  %v926_v29 = vadd.f32 %v2302_v13, %v2343_v23 }
 0x143   :  { %v575_v8 = vsel %vm511_vm14, %v479_v54, %v543_v1  ;;  %vm729_vm0 = vcmp.ge.f32.partialorder %v697_v2, 0.0  ;;  %v707_v54 = vadd.f32 %v2286_v58, %v2359_v45 }
 0x144   :  { %v791_v19 = vsel %vm727_vm7, %v695_v3, %v759_v9  ;;  %v533_v22 = vmul.f32 0.01, %v469_v11  ;;  %vm501_vm9 = vcmp.ge.f32.partialorder %v469_v11, 0.0  ;;  %v761_v9 = vmul.f32 0.01, %v697_v2 }
 0x145   :  { %v823_v33 = vmul.f32 %v2256_v38, %v791_v19  ;;  %v990_v18 = vmul.f32 0.01, %v926_v29  ;;  %vm958_vm3 = vcmp.ge.f32.partialorder %v926_v29, 0.0  ;;  %vm739_vm7 = vcmp.ge.f32.partialorder %v707_v54, 0.0 }
 0x146   :  { %428 = vadd.xlane.f32.xlu1 %v379_v24  ;;  %426 = vadd.xlane.f32.xlu0 %v378_v32  ;;  %v698_v24 = vadd.f32 %v2288_v63, %v2343_v23  ;;  %v600_v32 = vmul.f32 %v2256_v38, %v568_v17  ;;  %v607_v17 = vmul.f32 %v2256_v38, %v575_v8 }
 0x147   :  { %v793_v21 = vsel %vm729_vm0, %v697_v2, %v761_v9 }
 0x148   :  { %vm730_vm11 = vcmp.ge.f32.partialorder %v698_v24, 0.0  ;;  %v825_v34 = vmul.f32 %v2256_v38, %v793_v21 }
 0x14a   :  { %432 = vadd.xlane.f32.xlu1 %v381_v49  ;;  %430 = vadd.xlane.f32.xlu0 %v380_v53  ;;  %v565_v49 = vsel %vm501_vm9, %v469_v11, %v533_v22  ;;  %v762_v53 = vmul.f32 0.01, %v698_v24  ;;  %v700_v11 = vadd.f32 %v2290_v0, %v2343_v23 }
 0x14b   :  { %v597_v56 = vmul.f32 %v2256_v38, %v565_v49 }
 0x14c   :  { %v794_v25 = vsel %vm730_vm11, %v698_v24, %v762_v53  ;;  %v764_v22 = vmul.f32 0.01, %v700_v11  ;;  %v480_v24 = vadd.f32 %v2269_v44, %v2359_v45  ;;  %vm732_vm4 = vcmp.ge.f32.partialorder %v700_v11, 0.0 }
 0x14d   :  { %v826_v26 = vmul.f32 %v2256_v38, %v794_v25  ;;  %v925_v25 = vadd.f32 %v2322_v51, %v2326_v52 }
 0x14e   :  { %630 = vadd.xlane.f32.xlu1 %v594_v59  ;;  %632 = vadd.xlane.f32.xlu0 %v595_v60  ;;  %v986_v59 = vmul.f32 0.01, %v922_v46  ;;  %v473_v60 = vadd.f32 %v2300_v10, %v2343_v23  ;;  %v796_v48 = vsel %vm732_vm4, %v700_v11, %v764_v22  ;;  %v544_v49 = vmul.f32 0.01, %v480_v24 }
 0x14f   :  { %vm512_vm5 = vcmp.ge.f32.partialorder %v480_v24, 0.0  ;;  %v828_v57 = vmul.f32 %v2256_v38, %v796_v48  ;;  %vm957_vm9 = vcmp.ge.f32.partialorder %v925_v25, 0.0  ;;  %v936_v22 = vadd.f32 %v2320_v50, %v2359_v45 }
 0x150   :  { %v1018_v3 = vsel %vm954_vm13, %v922_v46, %v986_v59  ;;  %v537_v4 = vmul.f32 0.01, %v473_v60  ;;  %vm505_vm15 = vcmp.ge.f32.partialorder %v473_v60, 0.0  ;;  %v1022_v46 = vsel %vm958_vm3, %v926_v29, %v990_v18 }
 0x151   :  { %v1050_v7 = vmul.f32 %v2256_v38, %v1018_v3  ;;  %v576_v20 = vsel %vm512_vm5, %v480_v24, %v544_v49  ;;  %v989_v3 = vmul.f32 0.01, %v925_v25  ;;  %v1000_v48 = vmul.f32 0.01, %v936_v22 }
 0x152   :  { %638 = vadd.xlane.f32.xlu1 %v598_v5  ;;  %634 = vadd.xlane.f32.xlu0 %v596_v6  ;;  %v478_v5 = vadd.f32 %v2251_v37, %v2359_v45  ;;  %v1051_v6 = vmul.f32 %v2256_v38, %v1019_v62  ;;  %v708_v62 = vadd.f32 %v2290_v0, %v2359_v45 }
 0x153   :  { %v608_v1 = vmul.f32 %v2256_v38, %v576_v20  ;;  %v1021_v11 = vsel %vm957_vm9, %v925_v25, %v989_v3  ;;  %v241_v49 = vadd.f32 %v2259_v40, %v2249_v36  ;;  %v475_v3 = vadd.f32 %v2267_v43, %v2259_v40 }
 0x154   :  { %vm510_vm2 = vcmp.ge.f32.partialorder %v478_v5, 0.0  ;;  %vm740_vm11 = vcmp.ge.f32.partialorder %v708_v62, 0.0  ;;  %v772_v29 = vmul.f32 0.01, %v708_v62  ;;  %v1053_v18 = vmul.f32 %v2256_v38, %v1021_v11 }
 0x155   :  { %v305_v25 = vmul.f32 0.01, %v241_v49  ;;  %v476_v11 = vadd.f32 %v2269_v44, %v2259_v40  ;;  %v240_v44 = vadd.f32 %v2259_v40, %v2233_v28 }
 0x156   :  { %858 = vadd.xlane.f32.xlu1 %v822_v15  ;;  %640 = vadd.xlane.f32.xlu0 %v599_v16  ;;  %v569_v15 = vsel %vm505_vm15, %v473_v60, %v537_v4  ;;  %v542_v16 = vmul.f32 0.01, %v478_v5  ;;  %v771_v60 = vmul.f32 0.01, %v707_v54  ;;  %vm968_vm15 = vcmp.ge.f32.partialorder %v936_v22, 0.0 }
 0x157   :  { %v601_v19 = vmul.f32 %v2256_v38, %v569_v15  ;;  %v928_v15 = vadd.f32 %v2320_v50, %v2343_v23  ;;  %v1032_v20 = vsel %vm968_vm15, %v936_v22, %v1000_v48 }
 0x159   :  { %vm960_vm14 = vcmp.ge.f32.partialorder %v928_v15, 0.0 }
 0x15a   :  { %642 = vadd.xlane.f32.xlu1 %v600_v32  ;;  %860 = vadd.xlane.f32.xlu0 %v823_v33  ;;  %v574_v32 = vsel %vm510_vm2, %v478_v5, %v542_v16  ;;  %v924_v33 = vadd.f32 %v2320_v50, %v2326_v52  ;;  %v803_v52 = vsel %vm739_vm7, %v707_v54, %v771_v60  ;;  %vm273_vm2 = vcmp.ge.f32.partialorder %v241_v49, 0.0 }
 0x15b   :  { %v606_v39 = vmul.f32 %v2256_v38, %v574_v32  ;;  %v835_v8 = vmul.f32 %v2256_v38, %v803_v52  ;;  %v992_v32 = vmul.f32 0.01, %v928_v15 }
 0x15c   :  { %v988_v53 = vmul.f32 0.01, %v924_v33  ;;  %vm956_vm6 = vcmp.ge.f32.partialorder %v924_v33, 0.0 }
 0x15e   :  { %862 = vadd.xlane.f32.xlu1 %v824_v55  ;;  %636 = vadd.xlane.f32.xlu0 %v597_v56  ;;  %v927_v55 = vadd.f32 %v2310_v30, %v2343_v23  ;;  %v1054_v56 = vmul.f32 %v2256_v38, %v1022_v46  ;;  %v1020_v59 = vsel %vm956_vm6, %v924_v33, %v988_v53  ;;  %vm507_vm6 = vcmp.ge.f32.partialorder %v475_v3, 0.0 }
 0x15f   :  { %v1052_v2 = vmul.f32 %v2256_v38, %v1020_v59  ;;  %v481_v33 = vadd.f32 %v2300_v10, %v2359_v45  ;;  %v1024_v53 = vsel %vm960_vm14, %v928_v15, %v992_v32  ;;  %v243_v59 = vadd.f32 %v2259_v40, %v2247_v35 }
 0x160   :  { %vm959_vm8 = vcmp.ge.f32.partialorder %v927_v55, 0.0  ;;  %v937_v15 = vadd.f32 %v2322_v51, %v2359_v45  ;;  %v2510_v32 = vand.u32 127, %v138_v12  ;;  %v248_v12 = vadd.f32 %v2262_v41, %v2233_v28 }
 0x161   :  { %v545_v54 = vmul.f32 0.01, %v481_v33  ;;  %vm513_vm0 = vcmp.ge.f32.partialorder %v481_v33, 0.0  ;;  %vm275_vm4 = vcmp.ge.f32.partialorder %v243_v59, 0.0 }
 0x162   :  { %868 = vadd.xlane.f32.xlu1 %v827_v61  ;;  %866 = vadd.xlane.f32.xlu0 %v826_v26  ;;  %v991_v61 = vmul.f32 0.01, %v927_v55  ;;  %v701_v26 = vadd.f32 %v2312_v31, %v2343_v23  ;;  %v1001_v22 = vmul.f32 0.01, %v937_v15  ;;  %vm969_vm9 = vcmp.ge.f32.partialorder %v937_v15, 0.0  ;;  %3189 = vst [vmem:[#allocation12_spill] sm:$0xff] %v2510_v32 }
 0x163   :  { %v577_v60 = vsel %vm513_vm0, %v481_v33, %v545_v54  ;;  %v1180_v54 = vadd.s32 4294967288, %v2510_v32  ;;  %v312_v28 = vmul.f32 0.01, %v248_v12  ;;  %vm280_vm15 = vcmp.ge.f32.partialorder %v248_v12, 0.0 }
 0x164   :  { %v1023_v4 = vsel %vm959_vm8, %v927_v55, %v991_v61  ;;  %v765_v5 = vmul.f32 0.01, %v701_v26  ;;  %vm733_vm10 = vcmp.ge.f32.partialorder %v701_v26, 0.0  ;;  %v929_v55 = vadd.f32 %v2322_v51, %v2343_v23 }
 0x165   :  { %v1055_v9 = vmul.f32 %v2256_v38, %v1023_v4  ;;  %v1064_v23 = vmul.f32 %v2256_v38, %v1032_v20  ;;  %v709_v4 = vadd.f32 %v2312_v31, %v2359_v45  ;;  %vm508_vm8 = vcmp.ge.f32.partialorder %v476_v11, 0.0 }
 0x166   :  { %1088 = vadd.xlane.f32.xlu1 %v1051_v6  ;;  %1086 = vadd.xlane.f32.xlu0 %v1050_v7  ;;  %v706_v6 = vadd.f32 %v2288_v63, %v2359_v45  ;;  %v935_v7 = vadd.f32 %v2310_v30, %v2359_v45  ;;  %v797_v16 = vsel %vm733_vm10, %v701_v26, %v765_v5  ;;  %v993_v61 = vmul.f32 0.01, %v929_v55 }
 0x167   :  { %v829_v24 = vmul.f32 %v2256_v38, %v797_v16  ;;  %v934_v26 = vadd.f32 %v2302_v13, %v2359_v45  ;;  %vm961_vm3 = vcmp.ge.f32.partialorder %v929_v55, 0.0  ;;  %vm741_vm7 = vcmp.ge.f32.partialorder %v709_v4, 0.0 }
 0x168   :  { %vm738_vm12 = vcmp.ge.f32.partialorder %v706_v6, 0.0  ;;  %v999_v21 = vmul.f32 0.01, %v935_v7  ;;  %vm967_vm13 = vcmp.ge.f32.partialorder %v935_v7, 0.0  ;;  %v1025_v52 = vsel %vm961_vm3, %v929_v55, %v993_v61 }
 0x169   :  { %v998_v35 = vmul.f32 0.01, %v934_v26  ;;  %vm966_vm5 = vcmp.ge.f32.partialorder %v934_v26, 0.0  ;;  %v242_v51 = vadd.f32 %v2259_v40, %v2231_v27  ;;  %v474_v61 = vadd.f32 %v2251_v37, %v2259_v40 }
 0x16a   :  { %656 = vadd.xlane.f32.xlu1 %v607_v17  ;;  %644 = vadd.xlane.f32.xlu0 %v601_v19  ;;  %v770_v17 = vmul.f32 0.01, %v706_v6  ;;  %v804_v19 = vsel %vm740_vm11, %v708_v62, %v772_v29  ;;  %v1031_v46 = vsel %vm967_vm13, %v935_v7, %v999_v21  ;;  %v609_v62 = vmul.f32 %v2256_v38, %v577_v60 }
 0x16b   :  { %v1030_v7 = vsel %vm966_vm5, %v934_v26, %v998_v35  ;;  %v702_v21 = vadd.f32 %v2288_v63, %v2259_v40  ;;  %v306_v48 = vmul.f32 0.01, %v242_v51  ;;  %vm272_vm11 = vcmp.ge.f32.partialorder %v240_v44, 0.0 }
 0x16c   :  { %v1062_v16 = vmul.f32 %v2256_v38, %v1030_v7  ;;  %v704_v60 = vadd.f32 %v2290_v0, %v2259_v40  ;;  %v703_v0 = vadd.f32 %v2286_v58, %v2259_v40  ;;  %vm1185_vm0 = vcmask 130112  }
 0x16d   :  { %vm734_vm10 = vcmp.ge.f32.partialorder %v702_v21, 0.0  ;;  %v766_v63 = vmul.f32 0.01, %v702_v21  ;;  %vm506_vm3 = vcmp.ge.f32.partialorder %v474_v61, 0.0 }
 0x16e   :  { %864 = vadd.xlane.f32.xlu1 %v825_v34  ;;  %654 = vadd.xlane.f32.xlu0 %v606_v39  ;;  %v802_v34 = vsel %vm738_vm12, %v706_v6, %v770_v17  ;;  %v836_v39 = vmul.f32 %v2256_v38, %v804_v19  ;;  %v1057_v6 = vmul.f32 %v2256_v38, %v1025_v52  ;;  %v540_v19 = vmul.f32 0.01, %v476_v11 }
 0x16f   :  { %v834_v50 = vmul.f32 %v2256_v38, %v802_v34  ;;  %v249_v34 = vadd.f32 %v2262_v41, %v2249_v36  ;;  %vm274_vm12 = vcmp.ge.f32.partialorder %v242_v51, 0.0 }
 0x170   :  { %v572_v33 = vsel %vm508_vm8, %v476_v11, %v540_v19  ;;  %v767_v11 = vmul.f32 0.01, %v703_v0 }
 0x171   :  { %v604_v55 = vmul.f32 %v2256_v38, %v572_v33  ;;  %vm281_vm13 = vcmp.ge.f32.partialorder %v249_v34, 0.0 }
 0x172   :  { %1094 = vadd.xlane.f32.xlu1 %v1054_v56  ;;  %870 = vadd.xlane.f32.xlu0 %v828_v57  ;;  %v1063_v56 = vmul.f32 %v2256_v38, %v1031_v46  ;;  %v1056_v57 = vmul.f32 %v2256_v38, %v1024_v53  ;;  %v304_v46 = vmul.f32 0.01, %v240_v44  ;;  %v1194_v53 = vadd.s32 4294967272, %v2510_v32 }
 0x174   :  { %v336_v20 = vsel %vm272_vm11, %v240_v44, %v304_v46  ;;  %v2543_v35 = vsub.s32 %v1194_v53, %v2219_v14  ;;  %v1585_v44 = vadd.s32 4294967224, %v2510_v32 }
 0x176   :  { %658 = vadd.xlane.f32.xlu1 %v608_v1  ;;  %1090 = vadd.xlane.f32.xlu0 %v1052_v2  ;;  %v337_v1 = vsel %vm273_vm2, %v241_v49, %v305_v25  ;;  %v307_v2 = vmul.f32 0.01, %v243_v59  ;;  %v483_v49 = vadd.f32 %v2267_v43, %v2262_v41  ;;  %v313_v43 = vmul.f32 0.01, %v249_v34  ;;  %3190 = vst [vmem:[#allocation13_spill] sm:$0xff] %v2543_v35 }
 0x177   :  { %v375_v5 = vmul.f32 %v2256_v38, %v337_v1  ;;  %v338_v25 = vsel %vm274_vm12, %v242_v51, %v306_v48  ;;  %v374_v1 = vmul.f32 %v2256_v38, %v336_v20  ;;  %vm736_vm2 = vcmp.ge.f32.partialorder %v704_v60, 0.0 }
 0x178   :  { %v339_v29 = vsel %vm275_vm4, %v243_v59, %v307_v2  ;;  %v547_v59 = vmul.f32 0.01, %v483_v49  ;;  %vm515_vm14 = vcmp.ge.f32.partialorder %v483_v49, 0.0  ;;  %v345_v2 = vsel %vm281_vm13, %v249_v34, %v313_v43 }
 0x179   :  { %v377_v31 = vmul.f32 %v2256_v38, %v339_v29  ;;  %v376_v37 = vmul.f32 %v2256_v38, %v338_v25  ;;  %v250_v29 = vadd.f32 %v2262_v41, %v2231_v27  ;;  %v383_v7 = vmul.f32 %v2256_v38, %v345_v2  ;;  %v2600_v2 = vld [vmem:[#allocation3 + $0x30] sm:$0xff] }
 0x17a   :  { %884 = vadd.xlane.f32.xlu1 %v835_v8  ;;  %1096 = vadd.xlane.f32.xlu0 %v1055_v9  ;;  %v539_v8 = vmul.f32 0.01, %v475_v3  ;;  %v773_v9 = vmul.f32 0.01, %v709_v4  ;;  %v579_v52 = vsel %vm515_vm14, %v483_v49, %v547_v59  ;;  %vm1192_vm4 = vcmask 195712  }
 0x17b   :  { %v1393_v27 = vadd.s32 4294967248, %v2510_v32  ;;  %vm282_vm8 = vcmp.ge.f32.partialorder %v250_v29, 0.0  ;;  %v477_v51 = vadd.f32 %v2300_v10, %v2259_v40  ;;  %v1580_v34 = vadd.s32 4294967232, %v2510_v32 }
 0x17c   :  { %v571_v17 = vsel %vm507_vm6, %v475_v3, %v539_v8  ;;  %v2537_v3 = vsub.s32 %v2510_v32, %v2219_v14  ;;  %v1381_v8 = vadd.s32 4294967264, %v2510_v32  ;;  %vm3186_vm6 = vcmask 261312  }
 0x17d   :  { %v603_v45 = vmul.f32 %v2256_v38, %v571_v17  ;;  %v2571_v48 = vsub.s32 %v1393_v27, %v2219_v14  ;;  %v253_v10 = vadd.f32 %v2265_v42, %v2249_v36  ;;  %vm509_vm11 = vcmp.ge.f32.partialorder %v477_v51, 0.0 }
 0x17e   :  { %1092 = vadd.xlane.f32.xlu1 %v1053_v18  ;;  %872 = vadd.xlane.f32.xlu0 %v829_v24  ;;  %v805_v18 = vsel %vm741_vm7, %v709_v4, %v773_v9  ;;  %v2546_v4 = vsub.s32 %v1180_v54, %v2219_v14  ;;  %v1386_v9 = vadd.s32 4294967256, %v2510_v32  ;;  %vm735_vm7 = vcmp.ge.f32.partialorder %v703_v0, 0.0 }
 0x17f   :  { %v837_v24 = vmul.f32 %v2256_v38, %v805_v18  ;;  %v314_v18 = vmul.f32 0.01, %v250_v29  ;;  %v2593_v25 = vsub.s32 %v1580_v34, %v2219_v14  ;;  %v1592_v59 = vadd.s32 4294967216, %v2510_v32 }
 0x180   :  { %v2564_v33 = vsub.s32 %v1386_v9, %v2219_v14  ;;  %vm285_vm12 = vcmp.ge.f32.partialorder %v253_v10, 0.0  ;;  %vm1590_vm13 = vcmask 654912  }
 0x181   :  { %v2614_v9 = vsub.s32 %v1592_v59, %v2219_v14  ;;  %v2644_v59 = vld [vmem:[#allocation3 + $0x48] sm:$0xff] }
 0x182   :  { %886 = vadd.xlane.f32.xlu1 %v836_v39  ;;  %882 = vadd.xlane.f32.xlu0 %v834_v50  ;;  %v1033_v39 = vsel %vm969_vm9, %v937_v15, %v1001_v22  ;;  %v1187_v50 = vadd.s32 4294967280, %v2510_v32  ;;  %v611_v15 = vmul.f32 %v2256_v38, %v579_v52  ;;  %vm1391_vm9 = vcmask 392512  }
 0x186   :  { %1112 = vadd.xlane.f32.xlu1 %v1063_v56  ;;  %1098 = vadd.xlane.f32.xlu0 %v1056_v57  ;;  %v1065_v56 = vmul.f32 %v2256_v38, %v1033_v39  ;;  %v798_v57 = vsel %vm734_vm10, %v702_v21, %v766_v63  ;;  %v799_v63 = vsel %vm735_vm7, %v703_v0, %v767_v11  ;;  %vm1398_vm10 = vcmask 458112  }
 0x187   :  { %v830_v26 = vmul.f32 %v2256_v38, %v798_v57  ;;  %v2588_v57 = vsub.s32 %v1585_v44, %v2219_v14  ;;  %v484_v0 = vadd.f32 %v2600_v2, %v2262_v41  ;;  %vm1789_vm7 = vcmask 917312  }
 0x18a   :  { %1114 = vadd.xlane.f32.xlu1 %v1064_v23  ;;  %660 = vadd.xlane.f32.xlu0 %v609_v62  ;;  %v2530_v23 = vsub.s32 %v1187_v50, %v2219_v14  ;;  %v930_v62 = vadd.f32 %v2302_v13, %v2259_v40  ;;  %v344_v13 = vsel %vm280_vm15, %v248_v12, %v312_v28  ;;  %v2577_v50 = vld [vmem:[#allocation3 + $0x20] sm:$0xff]  ;;  %vm1597_vm15 = vcmask 720512  }
 0x18b   :  { %v346_v12 = vsel %vm282_vm8, %v250_v29, %v314_v18  ;;  %v482_v53 = vadd.f32 %v2577_v50, %v2262_v41  ;;  %v2621_v18 = vld [vmem:[#allocation3 + $0x28] sm:$0xff] }
 0x18c   :  { %v994_v58 = vmul.f32 0.01, %v930_v62  ;;  %vm962_vm5 = vcmp.ge.f32.partialorder %v930_v62, 0.0 }
 0x18d   :  { %vm514_vm14 = vcmp.ge.f32.partialorder %v482_v53, 0.0 }
 0x18e   :  { %420 = vadd.xlane.f32.xlu1 %v375_v5  ;;  %1100 = vadd.xlane.f32.xlu0 %v1057_v6  ;;  %v768_v5 = vmul.f32 0.01, %v704_v60  ;;  %v538_v6 = vmul.f32 0.01, %v474_v61  ;;  %v1026_v22 = vsel %vm962_vm5, %v930_v62, %v994_v58 }
 0x18f   :  { %v1058_v49 = vmul.f32 %v2256_v38, %v1026_v22 }
 0x190   :  { %v570_v17 = vsel %vm506_vm3, %v474_v61, %v538_v6  ;;  %v317_v61 = vmul.f32 0.01, %v253_v10  ;;  %v1400_v6 = vadd.s32 4294967240, %v2510_v32  ;;  %vm1405_vm3 = vcmask 523712  }
 0x191   :  { %v602_v46 = vmul.f32 %v2256_v38, %v570_v17  ;;  %v548_v17 = vmul.f32 0.01, %v484_v0 }
 0x192   :  { %424 = vadd.xlane.f32.xlu1 %v377_v31  ;;  %1110 = vadd.xlane.f32.xlu0 %v1062_v16  ;;  %v382_v31 = vmul.f32 %v2256_v38, %v344_v13  ;;  %v800_v16 = vsel %vm736_vm2, %v704_v60, %v768_v5  ;;  %v349_v11 = vsel %vm285_vm12, %v253_v10, %v317_v61  ;;  %vm516_vm2 = vcmp.ge.f32.partialorder %v484_v0, 0.0 }
 0x193   :  { %v832_v39 = vmul.f32 %v2256_v38, %v800_v16  ;;  %v541_v38 = vmul.f32 0.01, %v477_v51  ;;  %vm1604_vm12 = vcmask 786112  }
 0x195   :  { %v573_v5 = vsel %vm509_vm11, %v477_v51, %v541_v38  ;;  %v2627_v51 = vsub.s32 %v1400_v6, %v2219_v14  ;;  %v1798_v6 = vadd.s32 4294967176, %v2510_v32 }
 0x196   :  { %648 = vadd.xlane.f32.xlu1 %v603_v45  ;;  %888 = vadd.xlane.f32.xlu0 %v837_v24  ;;  %v3182_v45 = vmov 1   ;;  %v2561_v24 = vsub.s32 %v1381_v8, %v2219_v14  ;;  %v1779_v8 = vadd.s32 4294967200, %v2510_v32 }
 0x197   :  { %2045 = vset.pattern.permute.xlu1 %v3182_v45 }
 0x19a   :  { %650 = vadd.xlane.f32.xlu1 %v604_v55  ;;  %1116 = vadd.xlane.f32.xlu0 %v1065_v56  ;;  %v2584_v56 = vld [vmem:[%s3177_s4] ss:$0 sm:$0xff] }
 0x19b   :  { %v831_v36 = vmul.f32 %v2584_v56, %v799_v63  ;;  %v384_v60 = vmul.f32 %v2584_v56, %v346_v12  ;;  %v605_v44 = vmul.f32 %v2584_v56, %v573_v5 }
 0x19e   :  { %874 = vadd.xlane.f32.xlu1 %v830_v26  ;;  %418 = vadd.xlane.f32.xlu0 %v374_v1  ;;  %v546_v1 = vmul.f32 0.01, %v482_v53 }
 0x1a0   :  { %v578_v16 = vsel %vm514_vm14, %v482_v53, %v546_v1 }
 0x1a1   :  { %v610_v10 = vmul.f32 %v2584_v56, %v578_v16 }
 0x1a2   :  { %422 = vadd.xlane.f32.xlu0 %v376_v37  ;;  %436 = vadd.xlane.f32.xlu1 %v383_v7 }
 0x1a3   :  { %v399_v19 = vpop.xlane.xlu1 %398  ;;  %v395_v21 = vpop.xlane.xlu0 %394 }
 0x1a4   :  { %v1179_v43 = vrot.slane %v395_v21, %v2537_v3  ;;  %v1191_v28 = vrot.slane %v399_v19, %v2530_v23  ;;  %v487_v19 = vadd.f32 %v2621_v18, %v2265_v42 }
 0x1a6   :  { %664 = vadd.xlane.f32.xlu1 %v611_v15  ;;  %434 = vadd.xlane.f32.xlu0 %v382_v31  ;;  %v931_v15 = vadd.f32 %v2310_v30, %v2259_v40  ;;  %v1784_v31 = vadd.s32 4294967192, %v2510_v32  ;;  %v2629_v30 = vld [vmem:[#allocation3] sm:$0xff]  ;;  %vm519_vm8 = vcmp.ge.f32.partialorder %v487_v19, 0.0 }
 0x1a7   :  { %v401_v54 = vpop.xlane.xlu1 %400  ;;  %v397_v55 = vpop.xlane.xlu0 %396  ;;  %v252_v63 = vadd.f32 %v2629_v30, %v2265_v42 }
 0x1a8   :  { %v1184_v20 = vrot.slane %v397_v55, %v2546_v4  ;;  %v1198_v26 = vrot.slane %v401_v54, %v2543_v35  ;;  %vm963_vm5 = vcmp.ge.f32.partialorder %v931_v15, 0.0  ;;  %v2640_v12 = vsub.s32 %v1784_v31, %v2219_v14  ;;  %v2664_v31 = vld [vmem:[#allocation3 + $0x70] sm:$0xff] }
 0x1a9   :  { %v580_v54 = vsel %vm516_vm2, %v484_v0, %v548_v17  ;;  %v1599_v55 = vadd.s32 4294967208, %v2510_v32  ;;  %vm284_vm11 = vcmp.ge.f32.partialorder %v252_v63, 0.0 }
 0x1aa   :  { %v1186_v62 = vsel %vm1185_vm0, %v1184_v20, %v1179_v43  ;;  %878 = vadd.xlane.f32.xlu1 %v832_v39  ;;  %646 = vadd.xlane.f32.xlu0 %v602_v46  ;;  %v387_v39 = vmul.f32 %v2584_v56, %v349_v11  ;;  %v2636_v46 = vsub.s32 %v1779_v8, %v2219_v14  ;;  %v316_v20 = vmul.f32 0.01, %v252_v63 }
 0x1ab   :  { %v1193_v37 = vsel %vm1192_vm4, %v1191_v28, %v1186_v62  ;;  %v623_v52 = vpop.xlane.xlu1 %622  ;;  %v625_v13 = vpop.xlane.xlu0 %624  ;;  %v711_v28 = vadd.f32 %v2644_v59, %v2262_v41  ;;  %v486_v62 = vadd.f32 %v2577_v50, %v2265_v42  ;;  %v612_v1 = vmul.f32 %v2584_v56, %v580_v54 }
 0x1ac   :  { %v2608_v29 = vsel %vm3186_vm6, %v1198_v26, %v1193_v37  ;;  %v1385_v7 = vrot.slane %v623_v52, %v2561_v24  ;;  %v1390_v58 = vrot.slane %v625_v13, %v2564_v33  ;;  %v1791_v37 = vadd.s32 4294967184, %v2510_v32 }
 0x1ad   :  { %v2658_v13 = vsub.s32 %v1599_v55, %v2219_v14  ;;  %v348_v11 = vsel %vm284_vm11, %v252_v63, %v316_v20  ;;  %vm743_vm14 = vcmp.ge.f32.partialorder %v711_v28, 0.0  ;;  %vm518_vm2 = vcmp.ge.f32.partialorder %v486_v62, 0.0 }
 0x1ae   :  { %v1392_v27 = vsel %vm1391_vm9, %v1390_v58, %v1385_v7  ;;  %1102 = vadd.xlane.f32.xlu1 %v1058_v49  ;;  %876 = vadd.xlane.f32.xlu0 %v831_v36  ;;  %v995_v49 = vmul.f32 0.01, %v931_v15  ;;  %v551_v36 = vmul.f32 0.01, %v487_v19 }
 0x1af   :  { %v627_v21 = vpop.xlane.xlu1 %626  ;;  %v853_v22 = vpop.xlane.xlu0 %852 }
 0x1b0   :  { %v1397_v34 = vrot.slane %v627_v21, %v2571_v48  ;;  %v1589_v61 = vrot.slane %v853_v22, %v2588_v57  ;;  %v1027_v0 = vsel %vm963_vm5, %v931_v15, %v995_v49  ;;  %v583_v5 = vsel %vm519_vm8, %v487_v19, %v551_v36 }
 0x1b1   :  { %v775_v15 = vmul.f32 0.01, %v711_v28  ;;  %v1059_v17 = vmul.f32 %v2584_v56, %v1027_v0  ;;  %v550_v19 = vmul.f32 0.01, %v486_v62  ;;  %v615_v21 = vmul.f32 %v2584_v56, %v583_v5 }
 0x1b2   :  { %v1399_v53 = vsel %vm1398_vm10, %v1397_v34, %v1392_v27  ;;  %438 = vadd.xlane.f32.xlu1 %v384_v60  ;;  %652 = vadd.xlane.f32.xlu0 %v605_v44  ;;  %v932_v27 = vadd.f32 %v2664_v31, %v2259_v40  ;;  %v2672_v22 = vsub.s32 %v1791_v37, %v2219_v14  ;;  %v2674_v44 = vld [vmem:[#allocation3 + $0x58] sm:$0xff]  ;;  %vm3183_vm5 = vcmask 982912  }
 0x1b3   :  { %v851_v38 = vpop.xlane.xlu1 %850  ;;  %v855_v43 = vpop.xlane.xlu0 %854  ;;  %v705_v63 = vadd.f32 %v2674_v44, %v2259_v40  ;;  %v807_v55 = vsel %vm743_vm14, %v711_v28, %v775_v15  ;;  %vm3181_vm14 = vcmask 1048512   ;;  %v3184_v15 = vmov 0  }
 0x1b4   :  { %v1584_v60 = vrot.slane %v851_v38, %v2593_v25  ;;  %v1596_v26 = vrot.slane %v855_v43, %v2614_v9  ;;  %vm964_vm8 = vcmp.ge.f32.partialorder %v932_v27, 0.0  ;;  %v996_v36 = vmul.f32 0.01, %v932_v27  ;;  %v2685_v38 = vld [vmem:[#allocation3 + $0x10] sm:$0xff]  ;;  %2044 = vset.pattern.permute.xlu0 %v3184_v15 }
 0x1b5   :  { %v254_v43 = vadd.f32 %v2685_v38, %v2265_v42  ;;  %vm737_vm11 = vcmp.ge.f32.partialorder %v705_v63, 0.0 }
 0x1b6   :  { %v1591_v52 = vsel %vm1590_vm13, %v1589_v61, %v1584_v60  ;;  %444 = vadd.xlane.f32.xlu1 %v387_v39  ;;  %662 = vadd.xlane.f32.xlu0 %v610_v10  ;;  %v386_v39 = vmul.f32 %v2584_v56, %v348_v11  ;;  %v2683_v10 = vsub.s32 %v1798_v6, %v2219_v14  ;;  %v769_v14 = vmul.f32 0.01, %v705_v63 }
 0x1b7   :  { %v1598_v7 = vsel %vm1597_vm15, %v1596_v26, %v1591_v52  ;;  %v629_v58 = vpop.xlane.xlu1 %628  ;;  %v1079_v8 = vpop.xlane.xlu0 %1078  ;;  %v582_v60 = vsel %vm518_vm2, %v486_v62, %v550_v19  ;;  %v2693_v26 = vld [vmem:[#allocation3 + $0x40] sm:$0xff]  ;;  %v2703_v52 = vld [vmem:[#allocation3 + $0x18] sm:$0xff]  ;;  %v1028_v11 = vsel %vm964_vm8, %v932_v27, %v996_v36  ;;  %vm286_vm2 = vcmp.ge.f32.partialorder %v254_v43, 0.0 }
 0x1b8   :  { %v1404_v16 = vrot.slane %v629_v58, %v2627_v51  ;;  %v710_v28 = vadd.f32 %v2693_v26, %v2262_v41  ;;  %v251_v62 = vadd.f32 %v2703_v52, %v2262_v41  ;;  %v839_v58 = vmul.f32 %v2584_v56, %v807_v55 }
 0x1b9   :  { %v801_v19 = vsel %vm737_vm11, %v705_v63, %v769_v14  ;;  %v1060_v63 = vmul.f32 %v2584_v56, %v1028_v11  ;;  %v715_v11 = vadd.f32 %v2644_v59, %v2265_v42 }
 0x1ba   :  { %v2679_v34 = vsel %vm1405_vm3, %v1404_v16, %v1399_v53  ;;  %666 = vadd.xlane.f32.xlu1 %v612_v1  ;;  %1104 = vadd.xlane.f32.xlu0 %v1059_v17  ;;  %v1783_v53 = vrot.slane %v1079_v8, %v2636_v46  ;;  %v488_v1 = vadd.f32 %v2600_v2, %v2265_v42  ;;  %v318_v17 = vmul.f32 0.01, %v254_v43 }
 0x1bb   :  { %v1081_v49 = vpop.xlane.xlu1 %1080  ;;  %v857_v54 = vpop.xlane.xlu0 %856  ;;  %v614_v8 = vmul.f32 %v2584_v56, %v582_v60  ;;  %vm742_vm8 = vcmp.ge.f32.partialorder %v710_v28, 0.0  ;;  %v315_v55 = vmul.f32 0.01, %v251_v62  ;;  %vm283_vm11 = vcmp.ge.f32.partialorder %v251_v62, 0.0 }
 0x1bc   :  { %v1788_v20 = vrot.slane %v1081_v49, %v2640_v12  ;;  %v1603_v61 = vrot.slane %v857_v54, %v2658_v13  ;;  %v2714_v49 = vld [vmem:[#allocation3 + $0x50] sm:$0xff]  ;;  %vm520_vm1 = vcmp.ge.f32.partialorder %v488_v1, 0.0 }
 0x1bd   :  { %v712_v54 = vadd.f32 %v2714_v49, %v2262_v41 }
 0x1be   :  { %v1790_v0 = vsel %vm1789_vm7, %v1788_v20, %v1783_v53  ;;  %v2701_v37 = vsel %vm1604_vm12, %v1603_v61, %v1598_v7  ;;  %672 = vadd.xlane.f32.xlu1 %v615_v21  ;;  %442 = vadd.xlane.f32.xlu0 %v386_v39  ;;  %v774_v21 = vmul.f32 0.01, %v710_v28  ;;  %v552_v39 = vmul.f32 0.01, %v488_v1  ;;  %v2723_v61 = vld [vmem:[#allocation3 + $0x38] sm:$0xff] }
 0x1bf   :  { %v1083_v5 = vpop.xlane.xlu1 %1082  ;;  %v1085_v6 = vpop.xlane.xlu0 %1084  ;;  %v485_v60 = vadd.f32 %v2723_v61, %v2262_v41 }
 0x1c0   :  { %v1795_v7 = vrot.slane %v1083_v5, %v2672_v22  ;;  %v1802_v16 = vrot.slane %v1085_v6, %v2683_v10  ;;  %v833_v5 = vmul.f32 %v2584_v56, %v801_v19  ;;  %v350_v6 = vsel %vm286_vm2, %v254_v43, %v318_v17 }
 0x1c1   :  { %v388_v19 = vmul.f32 %v2584_v56, %v350_v6  ;;  %v549_v43 = vmul.f32 0.01, %v485_v60  ;;  %vm1334_vm2 = vcmask 1041409  }
 0x1c2   :  { %v1797_v27 = vsel %vm3183_vm5, %v1795_v7, %v1790_v0  ;;  %892 = vadd.xlane.f32.xlu1 %v839_v58  ;;  %670 = vadd.xlane.f32.xlu0 %v614_v8  ;;  %v806_v58 = vsel %vm742_vm8, %v710_v28, %v774_v21  ;;  %v584_v8 = vsel %vm520_vm1, %v488_v1, %v552_v39  ;;  %v776_v7 = vmul.f32 0.01, %v712_v54 }
 0x1c3   :  { %v2720_v36 = vsel %vm3181_vm14, %v1802_v16, %v1797_v27  ;;  %v405_v53 = vpop.xlane.xlu1 %404  ;;  %v403_v20 = vpop.xlane.xlu0 %402  ;;  %v347_v27 = vsel %vm283_vm11, %v251_v62, %v315_v55  ;;  %vm744_vm14 = vcmp.ge.f32.partialorder %v712_v54, 0.0  ;;  %v838_v17 = vmul.f32 %v2584_v56, %v806_v58  ;;  %v2744_v58 = vld [vmem:[#allocation3 + $0x68] sm:$0xff] }
 0x1c4   :  { %v1208_v14 = vrot.slane %v405_v53, %v2546_v4  ;;  %v1204_v0 = vrot.slane %v403_v20, %v2537_v3  ;;  %v714_v53 = vadd.f32 %v2693_v26, %v2265_v42  ;;  %vm517_vm1 = vcmp.ge.f32.partialorder %v485_v60, 0.0 }
 0x1c5   :  { %v616_v21 = vmul.f32 %v2584_v56, %v584_v8  ;;  %v385_v62 = vmul.f32 %v2584_v56, %v347_v27  ;;  %v808_v39 = vsel %vm744_vm14, %v712_v54, %v776_v7  ;;  %vm747_vm8 = vcmp.ge.f32.partialorder %v715_v11, 0.0 }
 0x1c6   :  { %v1209_v16 = vsel %vm1185_vm0, %v1208_v14, %v1204_v0  ;;  %1106 = vadd.xlane.f32.xlu1 %v1060_v63  ;;  %880 = vadd.xlane.f32.xlu0 %v833_v5  ;;  %v779_v63 = vmul.f32 0.01, %v715_v11  ;;  %v778_v14 = vmul.f32 0.01, %v714_v53  ;;  %v581_v6 = vsel %vm517_vm1, %v485_v60, %v549_v43 }
 0x1c7   :  { %v409_v20 = vpop.xlane.xlu1 %408  ;;  %v407_v45 = vpop.xlane.xlu0 %406  ;;  %v939_v8 = vadd.f32 %v2744_v58, %v2262_v41  ;;  %vm746_vm14 = vcmp.ge.f32.partialorder %v714_v53, 0.0  ;;  %v840_v60 = vmul.f32 %v2584_v56, %v808_v39  ;;  %vm1336_vm5 = vcmask 1042434  }
 0x1c8   :  { %v1218_v28 = vrot.slane %v409_v20, %v2543_v35  ;;  %v1213_v1 = vrot.slane %v407_v45, %v2530_v23  ;;  %v2748_v20 = vld [vmem:[#allocation3 + $0x78] sm:$0xff] }
 0x1c9   :  { %v933_v54 = vadd.f32 %v2748_v20, %v2259_v40  ;;  %v811_v40 = vsel %vm747_vm8, %v715_v11, %v779_v63  ;;  %vm971_vm11 = vcmp.ge.f32.partialorder %v939_v8, 0.0 }
 0x1ca   :  { %v1214_v55 = vsel %vm1192_vm4, %v1213_v1, %v1209_v16  ;;  %446 = vadd.xlane.f32.xlu1 %v388_v19  ;;  %890 = vadd.xlane.f32.xlu0 %v838_v17  ;;  %v716_v19 = vadd.f32 %v2714_v49, %v2265_v42  ;;  %v810_v17 = vsel %vm746_vm14, %v714_v53, %v778_v14 }
 0x1cb   :  { %v1219_v0 = vsel %vm3186_vm6, %v1218_v28, %v1214_v55  ;;  %v413_v5 = vpop.xlane.xlu1 %412  ;;  %v411_v45 = vpop.xlane.xlu0 %410  ;;  %v613_v28 = vmul.f32 %v2584_v56, %v581_v6  ;;  %v1003_v55 = vmul.f32 0.01, %v939_v8  ;;  %vm965_vm1 = vcmp.ge.f32.partialorder %v933_v54, 0.0 }
 0x1cc   :  { %v1335_v7 = vsel %vm1334_vm2, %v1219_v0, %v2608_v29  ;;  %v1227_v16 = vrot.slane %v413_v5, %v2546_v4  ;;  %v1223_v27 = vrot.slane %v411_v45, %v2537_v3  ;;  %v997_v0 = vmul.f32 0.01, %v933_v54  ;;  %v2764_v45 = vld [vmem:[#allocation3 + $0x60] sm:$0xff] }
 0x1cd   :  { %v842_v53 = vmul.f32 %v2584_v56, %v810_v17  ;;  %vm748_vm8 = vcmp.ge.f32.partialorder %v716_v19, 0.0  ;;  %v780_v63 = vmul.f32 0.01, %v716_v19  ;;  %v255_v17 = vadd.f32 %v2703_v52, %v2265_v42 }
 0x1ce   :  { %v1228_v43 = vsel %vm1185_vm0, %v1227_v16, %v1223_v27  ;;  %674 = vadd.xlane.f32.xlu1 %v616_v21  ;;  %440 = vadd.xlane.f32.xlu0 %v385_v62  ;;  %v938_v21 = vadd.f32 %v2764_v45, %v2262_v41  ;;  %v843_v62 = vmul.f32 %v2584_v56, %v811_v40 }
 0x1cf   :  { %v417_v1 = vpop.xlane.xlu1 %416  ;;  %v415_v29 = vpop.xlane.xlu0 %414  ;;  %v1035_v27 = vsel %vm971_vm11, %v939_v8, %v1003_v55 }
 0x1d0   :  { %v1237_v5 = vrot.slane %v417_v1, %v2543_v35  ;;  %v1232_v39 = vrot.slane %v415_v29, %v2530_v23  ;;  %v1029_v1 = vsel %vm965_vm1, %v933_v54, %v997_v0  ;;  %v940_v29 = vadd.f32 %v2664_v31, %v2262_v41 }
 0x1d1   :  { %vm970_vm14 = vcmp.ge.f32.partialorder %v938_v21, 0.0  ;;  %v1067_v55 = vmul.f32 %v2584_v56, %v1035_v27  ;;  %v812_v0 = vsel %vm748_vm8, %v716_v19, %v780_v63  ;;  %vm287_vm1 = vcmp.ge.f32.partialorder %v255_v17, 0.0 }
 0x1d2   :  { %v1233_v11 = vsel %vm1192_vm4, %v1232_v39, %v1228_v43  ;;  %894 = vadd.xlane.f32.xlu1 %v840_v60  ;;  %668 = vadd.xlane.f32.xlu0 %v613_v28  ;;  %v1002_v28 = vmul.f32 0.01, %v938_v21  ;;  %v1004_v39 = vmul.f32 0.01, %v940_v29  ;;  %vm972_vm11 = vcmp.ge.f32.partialorder %v940_v29, 0.0 }
 0x1d3   :  { %v1238_v14 = vsel %vm3186_vm6, %v1237_v5, %v1233_v11  ;;  %v429_v6 = vpop.xlane.xlu1 %428  ;;  %v427_v16 = vpop.xlane.xlu0 %426 }
 0x1d4   :  { %v2776_v40 = vsel %vm1336_vm5, %v1238_v14, %v1335_v7  ;;  %v1265_v60 = vrot.slane %v429_v6, %v2546_v4  ;;  %v1261_v43 = vrot.slane %v427_v16, %v2537_v3  ;;  %v1061_v7 = vmul.f32 %v2584_v56, %v1029_v1 }
 0x1d5   :  { %3191 = vst [vmem:[#allocation14_spill] sm:$0xff] %v2776_v40  ;;  %v1034_v6 = vsel %vm970_vm14, %v938_v21, %v1002_v28  ;;  %v943_v16 = vadd.f32 %v2744_v58, %v2265_v42  ;;  %v844_v21 = vmul.f32 %v2584_v56, %v812_v0 }
 0x1d6   :  { %v1266_v5 = vsel %vm1185_vm0, %v1265_v60, %v1261_v43  ;;  %900 = vadd.xlane.f32.xlu1 %v843_v62  ;;  %898 = vadd.xlane.f32.xlu0 %v842_v53  ;;  %v319_v62 = vmul.f32 0.01, %v255_v17  ;;  %v489_v53 = vadd.f32 %v2723_v61, %v2265_v42  ;;  %v1066_v60 = vmul.f32 %v2584_v56, %v1034_v6 }
 0x1d7   :  { %v433_v8 = vpop.xlane.xlu1 %432  ;;  %v431_v54 = vpop.xlane.xlu0 %430  ;;  %v944_v43 = vadd.f32 %v2664_v31, %v2265_v42  ;;  %vm975_vm8 = vcmp.ge.f32.partialorder %v943_v16, 0.0 }
 0x1d8   :  { %v1275_v11 = vrot.slane %v433_v8, %v2543_v35  ;;  %v1270_v14 = vrot.slane %v431_v54, %v2530_v23  ;;  %v1007_v54 = vmul.f32 0.01, %v943_v16  ;;  %vm521_vm14 = vcmp.ge.f32.partialorder %v489_v53, 0.0 }
 0x1da   :  { %v1271_v27 = vsel %vm1192_vm4, %v1270_v14, %v1266_v5  ;;  %1120 = vadd.xlane.f32.xlu1 %v1067_v55  ;;  %1108 = vadd.xlane.f32.xlu0 %v1061_v7  ;;  %v1036_v5 = vsel %vm972_vm11, %v940_v29, %v1004_v39  ;;  %v351_v55 = vsel %vm287_vm1, %v255_v17, %v319_v62  ;;  %v553_v7 = vmul.f32 0.01, %v489_v53 }
 0x1db   :  { %v2794_v19 = vsel %vm3186_vm6, %v1275_v11, %v1271_v27  ;;  %v631_v63 = vpop.xlane.xlu1 %630  ;;  %v633_v1 = vpop.xlane.xlu0 %632  ;;  %v713_v11 = vadd.f32 %v2674_v44, %v2262_v41  ;;  %v945_v27 = vadd.f32 %v2748_v20, %v2265_v42  ;;  %v942_v29 = vadd.f32 %v2764_v45, %v2265_v42 }
 0x1dc   :  { %3192 = vst [vmem:[#allocation15_spill] sm:$0xff] %v2794_v19  ;;  %v1410_v28 = vrot.slane %v631_v63, %v2561_v24  ;;  %v1414_v8 = vrot.slane %v633_v1, %v2564_v33  ;;  %v1068_v17 = vmul.f32 %v2584_v56, %v1036_v5  ;;  %v389_v39 = vmul.f32 %v2584_v56, %v351_v55  ;;  %v2068_v19 = vld [vmem:[#allocation3 + $0x8] sm:$0xff] }
 0x1dd   :  { %v1039_v62 = vsel %vm975_vm8, %v943_v16, %v1007_v54  ;;  %v717_v63 = vadd.f32 %v2674_v44, %v2265_v42  ;;  %v585_v1 = vsel %vm521_vm14, %v489_v53, %v553_v7  ;;  %vm976_vm11 = vcmp.ge.f32.partialorder %v944_v43, 0.0 }
 0x1de   :  { %v2805_v14 = vsel %vm1391_vm9, %v1414_v8, %v1410_v28  ;;  %902 = vadd.xlane.f32.xlu1 %v844_v21  ;;  %1118 = vadd.xlane.f32.xlu0 %v1066_v60  ;;  %v1008_v21 = vmul.f32 0.01, %v944_v43  ;;  %v777_v60 = vmul.f32 0.01, %v713_v11  ;;  %vm745_vm1 = vcmp.ge.f32.partialorder %v713_v11, 0.0 }
 0x1df   :  { %v2807_v0 = vpop.xlane.xlu1 %638  ;;  %v635_v6 = vpop.xlane.xlu0 %634  ;;  %v1071_v15 = vmul.f32 %v2584_v56, %v1039_v62  ;;  %v1009_v32 = vmul.f32 0.01, %v945_v27  ;;  %v1006_v5 = vmul.f32 0.01, %v942_v29  ;;  %v257_v16 = vadd.f32 %v2068_v19, %v2272_v47 }
 0x1e0   :  { %v617_v54 = vmul.f32 %v2584_v56, %v585_v1  ;;  %vm977_vm8 = vcmp.ge.f32.partialorder %v945_v27, 0.0  ;;  %vm974_vm14 = vcmp.ge.f32.partialorder %v942_v29, 0.0  ;;  %v781_v42 = vmul.f32 0.01, %v717_v63 }
 0x1e1   :  { %v1040_v53 = vsel %vm976_vm11, %v944_v43, %v1008_v21  ;;  %v809_v55 = vsel %vm745_vm1, %v713_v11, %v777_v60  ;;  %vm749_vm6 = vcmp.ge.f32.partialorder %v717_v63, 0.0  ;;  %v941_v7 = vadd.f32 %v2748_v20, %v2262_v41 }
 0x1e2   :  { %1122 = vadd.xlane.f32.xlu1 %v1068_v17  ;;  %448 = vadd.xlane.f32.xlu0 %v389_v39  ;;  %v1041_v62 = vsel %vm977_vm8, %v945_v27, %v1009_v32  ;;  %v1038_v40 = vsel %vm974_vm14, %v942_v29, %v1006_v5  ;;  %v321_v35 = vmul.f32 0.01, %v257_v16  ;;  %v491_v19 = vadd.f32 %v2621_v18, %v2272_v47 }
 0x1e3   :  { %v859_v28 = vpop.xlane.xlu1 %858  ;;  %v2817_v8 = vpop.xlane.xlu0 %640  ;;  %v1072_v1 = vmul.f32 %v2584_v56, %v1040_v53  ;;  %v841_v43 = vmul.f32 %v2584_v56, %v809_v55  ;;  %v813_v11 = vsel %vm749_vm6, %v717_v63, %v781_v42  ;;  %vm289_vm11 = vcmp.ge.f32.partialorder %v257_v16, 0.0 }
 0x1e4   :  { %v258_v41 = vadd.f32 %v2685_v38, %v2272_v47  ;;  %v1073_v32 = vmul.f32 %v2584_v56, %v1041_v62  ;;  %v1070_v27 = vmul.f32 %v2584_v56, %v1038_v40  ;;  %vm973_vm1 = vcmp.ge.f32.partialorder %v941_v7, 0.0 }
 0x1e5   :  { %v1005_v18 = vmul.f32 0.01, %v941_v7  ;;  %v1609_v29 = vrot.slane %v859_v28, %v2593_v25  ;;  %v845_v5 = vmul.f32 %v2584_v56, %v813_v11  ;;  %vm523_vm6 = vcmp.ge.f32.partialorder %v491_v19, 0.0 }
 0x1e6   :  { %1128 = vadd.xlane.f32.xlu1 %v1071_v15  ;;  %676 = vadd.xlane.f32.xlu0 %v617_v54  ;;  %v1419_v15 = vrot.slane %v635_v6, %v2571_v48  ;;  %v353_v6 = vsel %vm289_vm11, %v257_v16, %v321_v35  ;;  %v555_v42 = vmul.f32 0.01, %v491_v19  ;;  %v256_v53 = vadd.f32 %v2629_v30, %v2272_v47 }
 0x1e7   :  { %v2824_v17 = vpop.xlane.xlu1 %642  ;;  %v861_v39 = vpop.xlane.xlu0 %860  ;;  %v492_v28 = vadd.f32 %v2600_v2, %v2272_v47  ;;  %v490_v35 = vadd.f32 %v2577_v50, %v2272_v47  ;;  %v1037_v30 = vsel %vm973_vm1, %v941_v7, %v1005_v18  ;;  %vm290_vm8 = vcmp.ge.f32.partialorder %v258_v41, 0.0 }
 0x1e8   :  { %v1613_v21 = vrot.slane %v861_v39, %v2588_v57  ;;  %v1420_v40 = vsel %vm1398_vm10, %v1419_v15, %v2805_v14  ;;  %v322_v2 = vmul.f32 0.01, %v258_v41  ;;  %v587_v15 = vsel %vm523_vm6, %v491_v19, %v555_v42 }
 0x1e9   :  { %vm288_vm14 = vcmp.ge.f32.partialorder %v256_v53, 0.0  ;;  %vm524_vm11 = vcmp.ge.f32.partialorder %v492_v28, 0.0  ;;  %v554_v7 = vmul.f32 0.01, %v490_v35  ;;  %vm522_vm1 = vcmp.ge.f32.partialorder %v490_v35, 0.0 }
 0x1ea   :  { %1130 = vadd.xlane.f32.xlu1 %v1072_v1  ;;  %896 = vadd.xlane.f32.xlu0 %v841_v43  ;;  %v1614_v55 = vsel %vm1590_vm13, %v1613_v21, %v1609_v29  ;;  %v391_v43 = vmul.f32 %v2584_v56, %v353_v6  ;;  %v320_v21 = vmul.f32 0.01, %v256_v53  ;;  %v718_v18 = vadd.f32 %v2693_v26, %v2272_v47 }
 0x1eb   :  { %v863_v60 = vpop.xlane.xlu1 %862  ;;  %v637_v63 = vpop.xlane.xlu0 %636  ;;  %v1069_v19 = vmul.f32 %v2584_v56, %v1037_v30  ;;  %v354_v6 = vsel %vm290_vm8, %v258_v41, %v322_v2  ;;  %v1438_v26 = vrot.slane %v2824_v17, %v2571_v48  ;;  %v1429_v41 = vrot.slane %v2807_v0, %v2561_v24 }
 0x1ec   :  { %v1618_v54 = vrot.slane %v863_v60, %v2614_v9  ;;  %v1424_v38 = vrot.slane %v637_v63, %v2627_v51  ;;  %v619_v63 = vmul.f32 %v2584_v56, %v587_v15  ;;  %v782_v30 = vmul.f32 0.01, %v718_v18 }
 0x1ed   :  { %v392_v17 = vmul.f32 %v2584_v56, %v354_v6  ;;  %vm750_vm8 = vcmp.ge.f32.partialorder %v718_v18, 0.0  ;;  %v259_v0 = vadd.f32 %v2703_v52, %v2272_v47  ;;  %v720_v52 = vadd.f32 %v2714_v49, %v2272_v47 }
 0x1ee   :  { %v2850_v16 = vsel %vm1597_vm15, %v1618_v54, %v1614_v55  ;;  %v1425_v39 = vsel %vm1405_vm3, %v1424_v38, %v1420_v40  ;;  %1132 = vadd.xlane.f32.xlu1 %v1073_v32  ;;  %1126 = vadd.xlane.f32.xlu0 %v1070_v27  ;;  %v556_v32 = vmul.f32 0.01, %v492_v28  ;;  %v1433_v54 = vrot.slane %v2817_v8, %v2564_v33 }
 0x1ef   :  { %v1540_v14 = vsel %vm1334_vm2, %v1425_v39, %v2679_v34  ;;  %v869_v62 = vpop.xlane.xlu1 %868  ;;  %v867_v1 = vpop.xlane.xlu0 %866  ;;  %v719_v34 = vadd.f32 %v2644_v59, %v2272_v47  ;;  %v352_v59 = vsel %vm288_vm14, %v256_v53, %v320_v21  ;;  %v586_v40 = vsel %vm522_vm1, %v490_v35, %v554_v7 }
 0x1f0   :  { %v1632_v50 = vrot.slane %v869_v62, %v2588_v57  ;;  %v1628_v11 = vrot.slane %v867_v1, %v2593_v25  ;;  %v588_v42 = vsel %vm524_vm11, %v492_v28, %v556_v32  ;;  %v493_v55 = vadd.f32 %v2723_v61, %v2272_v47 }
 0x1f1   :  { %v783_v39 = vmul.f32 0.01, %v719_v34  ;;  %vm751_vm6 = vcmp.ge.f32.partialorder %v719_v34, 0.0  ;;  %v1434_v28 = vsel %vm1391_vm9, %v1433_v54, %v1429_v41  ;;  %v390_v35 = vmul.f32 %v2584_v56, %v352_v59 }
 0x1f2   :  { %v2861_v27 = vsel %vm1590_vm13, %v1632_v50, %v1628_v11  ;;  %904 = vadd.xlane.f32.xlu0 %v845_v5  ;;  %452 = vadd.xlane.f32.xlu1 %v391_v43  ;;  %v1439_v1 = vsel %vm1398_vm10, %v1438_v26, %v1434_v28  ;;  %v620_v43 = vmul.f32 %v2584_v56, %v588_v42  ;;  %v557_v21 = vmul.f32 0.01, %v493_v55 }
 0x1f3   :  { %v1089_v29 = vpop.xlane.xlu1 %1088  ;;  %v1087_v60 = vpop.xlane.xlu0 %1086  ;;  %v618_v2 = vmul.f32 %v2584_v56, %v586_v40  ;;  %v815_v11 = vsel %vm751_vm6, %v719_v34, %v783_v39  ;;  %v814_v15 = vsel %vm750_vm8, %v718_v18, %v782_v30  ;;  %vm525_vm14 = vcmp.ge.f32.partialorder %v493_v55, 0.0 }
 0x1f4   :  { %v1812_v5 = vrot.slane %v1089_v29, %v2640_v12  ;;  %v1808_v38 = vrot.slane %v1087_v60, %v2636_v46  ;;  %v946_v60 = vadd.f32 %v2764_v45, %v2272_v47  ;;  %v323_v18 = vmul.f32 0.01, %v259_v0 }
 0x1f5   :  { %v847_v6 = vmul.f32 %v2584_v56, %v815_v11  ;;  %vm291_vm11 = vcmp.ge.f32.partialorder %v259_v0, 0.0  ;;  %v589_v45 = vsel %vm525_vm14, %v493_v55, %v557_v21  ;;  %vm752_vm1 = vcmp.ge.f32.partialorder %v720_v52, 0.0 }
 0x1f6   :  { %v2883_v8 = vsel %vm1789_vm7, %v1812_v5, %v1808_v38  ;;  %1124 = vadd.xlane.f32.xlu0 %v1069_v19  ;;  %680 = vadd.xlane.f32.xlu1 %v619_v63  ;;  %v784_v26 = vmul.f32 0.01, %v720_v52  ;;  %v1010_v42 = vmul.f32 0.01, %v946_v60  ;;  %v355_v41 = vsel %vm291_vm11, %v259_v0, %v323_v18 }
 0x1f7   :  { %v657_v53 = vpop.xlane.xlu1 %656  ;;  %v645_v62 = vpop.xlane.xlu0 %644  ;;  %vm978_vm6 = vcmp.ge.f32.partialorder %v946_v60, 0.0  ;;  %v721_v39 = vadd.f32 %v2674_v44, %v2272_v47  ;;  %v949_v44 = vadd.f32 %v2748_v20, %v2272_v47  ;;  %v948_v0 = vadd.f32 %v2664_v31, %v2272_v47 }
 0x1f8   :  { %v1443_v61 = vrot.slane %v645_v62, %v2627_v51  ;;  %v1471_v19 = vrot.slane %v657_v53, %v2564_v33  ;;  %v621_v53 = vmul.f32 %v2584_v56, %v589_v45  ;;  %v393_v62 = vmul.f32 %v2584_v56, %v355_v41 }
 0x1f9   :  { %v1042_v28 = vsel %vm978_vm6, %v946_v60, %v1010_v42  ;;  %vm3193_vm14 = vcmask 982912   ;;  %vm753_vm11 = vcmp.ge.f32.partialorder %v721_v39, 0.0  ;;  %vm980_vm6 = vcmp.ge.f32.partialorder %v948_v0, 0.0 }
 0x1fa   :  { %v1444_v50 = vsel %vm1405_vm3, %v1443_v61, %v1439_v1  ;;  %454 = vadd.xlane.f32.xlu1 %v392_v17  ;;  %450 = vadd.xlane.f32.xlu0 %v390_v35  ;;  %v816_v17 = vsel %vm752_vm1, %v720_v52, %v784_v26  ;;  %vm981_vm1 = vcmp.ge.f32.partialorder %v949_v44, 0.0 }
 0x1fb   :  { %v2896_v32 = vsel %vm1336_vm5, %v1444_v50, %v1540_v14  ;;  %v865_v7 = vpop.xlane.xlu1 %864  ;;  %v655_v29 = vpop.xlane.xlu0 %654  ;;  %v846_v14 = vmul.f32 %v2584_v56, %v814_v15  ;;  %v848_v11 = vmul.f32 %v2584_v56, %v816_v17  ;;  %v1074_v15 = vmul.f32 %v2584_v56, %v1042_v28 }
 0x1fc   :  { %v1623_v63 = vrot.slane %v865_v7, %v2658_v13  ;;  %v1467_v34 = vrot.slane %v655_v29, %v2561_v24  ;;  %v1012_v29 = vmul.f32 0.01, %v948_v0 }
 0x1fe   :  { %v1624_v54 = vsel %vm1604_vm12, %v1623_v63, %v2850_v16  ;;  %v1472_v49 = vsel %vm1391_vm9, %v1471_v19, %v1467_v34  ;;  %682 = vadd.xlane.f32.xlu1 %v620_v43  ;;  %678 = vadd.xlane.f32.xlu0 %v618_v2  ;;  %v947_v16 = vadd.f32 %v2744_v58, %v2272_v47  ;;  %v1013_v47 = vmul.f32 0.01, %v949_v44 }
 0x1ff   :  { %v1739_v5 = vsel %vm1334_vm2, %v1624_v54, %v2701_v37  ;;  %v1095_v38 = vpop.xlane.xlu1 %1094  ;;  %v871_v59 = vpop.xlane.xlu0 %870 }
 0x200   :  { %v1637_v40 = vrot.slane %v871_v59, %v2614_v9  ;;  %v1011_v35 = vmul.f32 0.01, %v947_v16  ;;  %vm979_vm8 = vcmp.ge.f32.partialorder %v947_v16, 0.0  ;;  %v1827_v20 = vrot.slane %v1095_v38, %v2636_v46 }
 0x202   :  { %v1638_v55 = vsel %vm1597_vm15, %v1637_v40, %v2861_v27  ;;  %908 = vadd.xlane.f32.xlu1 %v847_v6  ;;  %906 = vadd.xlane.f32.xlu0 %v846_v14  ;;  %v785_v27 = vmul.f32 0.01, %v721_v39  ;;  %v1043_v7 = vsel %vm979_vm8, %v947_v16, %v1011_v35  ;;  %v1045_v6 = vsel %vm981_vm1, %v949_v44, %v1013_v47 }
 0x203   :  { %v659_v37 = vpop.xlane.xlu1 %658  ;;  %v1091_v30 = vpop.xlane.xlu0 %1090  ;;  %v1075_v19 = vmul.f32 %v2584_v56, %v1043_v7  ;;  %v1044_v14 = vsel %vm980_vm6, %v948_v0, %v1012_v29  ;;  %vm3194_vm8 = vcmask 1048512   ;;  %v1077_v42 = vmul.f32 %v2584_v56, %v1045_v6  ;;  %v2010_v29 = vld [vmem:[#allocation2] ss:$0 sm:$0xff] }
 0x204   :  { %v1476_v61 = vrot.slane %v659_v37, %v2571_v48  ;;  %v1817_v58 = vrot.slane %v1091_v30, %v2672_v22  ;;  %v817_v31 = vsel %vm753_vm11, %v721_v39, %v785_v27  ;;  %v1076_v39 = vmul.f32 %v2584_v56, %v1044_v14 }
 0x205   :  { %v849_v18 = vmul.f32 %v2584_v56, %v817_v31  ;;  %vm1338_vm1 = vcmask 1043459   ;;  %vm1340_vm6 = vcmask 1044484  }
 0x206   :  { %v1477_v1 = vsel %vm1398_vm10, %v1476_v61, %v1472_v49  ;;  %v1818_v43 = vsel %vm3193_vm14, %v1817_v58, %v2883_v8  ;;  %684 = vadd.xlane.f32.xlu1 %v621_v53  ;;  %456 = vadd.xlane.f32.xlu0 %v393_v62 }
 0x207   :  { %v885_v2 = vpop.xlane.xlu1 %884  ;;  %v1097_v50 = vpop.xlane.xlu0 %1096 }
 0x208   :  { %v1831_v21 = vrot.slane %v1097_v50, %v2640_v12  ;;  %v1670_v40 = vrot.slane %v885_v2, %v2588_v57 }
 0x20a   :  { %v1832_v8 = vsel %vm1789_vm7, %v1831_v21, %v1827_v20  ;;  %910 = vadd.xlane.f32.xlu1 %v848_v11  ;;  %1134 = vadd.xlane.f32.xlu0 %v1074_v15 }
 0x20b   :  { %v1093_v52 = vpop.xlane.xlu1 %1092  ;;  %v873_v60 = vpop.xlane.xlu0 %872 }
 0x20c   :  { %v1822_v63 = vrot.slane %v1093_v52, %v2683_v10  ;;  %v1642_v34 = vrot.slane %v873_v60, %v2658_v13 }
 0x20e   :  { %v1823_v54 = vsel %vm3194_vm8, %v1822_v63, %v1818_v43  ;;  %v1643_v49 = vsel %vm1604_vm12, %v1642_v34, %v1638_v55  ;;  %1136 = vadd.xlane.f32.xlu1 %v1075_v19  ;;  %912 = vadd.xlane.f32.xlu0 %v849_v18  ;;  %v3198_v19 = vmov 0  }
 0x20f   :  { %v1938_v45 = vsel %vm1334_vm2, %v1823_v54, %v2720_v36  ;;  %v2944_v38 = vsel %vm1336_vm5, %v1643_v49, %v1739_v5  ;;  %v887_v59 = vpop.xlane.xlu1 %886  ;;  %v883_v26 = vpop.xlane.xlu0 %882  ;;  %vm3195_vm2 = vmmov %vm3193_vm14  ;;  %v3200_v49 = vmov 1  }
 0x210   :  { %v1675_v41 = vrot.slane %v887_v59, %v2614_v9  ;;  %v1666_v16 = vrot.slane %v883_v26, %v2593_v25  ;;  %vm3196_vm14 = vmmov %vm3194_vm8 }
 0x211   :  { %vm3197_vm11 = vmmov %vm3195_vm2 }
 0x212   :  { %v1671_v55 = vsel %vm1590_vm13, %v1670_v40, %v1666_v16  ;;  %1140 = vadd.xlane.f32.xlu1 %v1077_v42  ;;  %1138 = vadd.xlane.f32.xlu0 %v1076_v39  ;;  %v3201_v40 = vld [vmem:[#allocation13_spill] sm:$0xff] }
 0x213   :  { %v1113_v36 = vpop.xlane.xlu1 %1112  ;;  %v1099_v37 = vpop.xlane.xlu0 %1098  ;;  %v1676_v5 = vsel %vm1597_vm15, %v1675_v41, %v1671_v55 }
 0x214   :  { %v1836_v30 = vrot.slane %v1099_v37, %v2672_v22  ;;  %v1869_v2 = vrot.slane %v1113_v36, %v2640_v12  ;;  %v3203_v37 = vld [vmem:[#allocation14_spill] sm:$0xff] }
 0x216   :  { %v1837_v53 = vsel %vm3195_vm2, %v1836_v30, %v1832_v8 }
 0x217   :  { %v1115_v62 = vpop.xlane.xlu1 %1114  ;;  %v661_v17 = vpop.xlane.xlu0 %660 }
 0x218   :  { %v1481_v28 = vrot.slane %v661_v17, %v2627_v51  ;;  %v1874_v11 = vrot.slane %v1115_v62, %v2672_v22  ;;  %v3204_v62 = vld [vmem:[#allocation15_spill] sm:$0xff] }
 0x21a   :  { %v2957_v61 = vsel %vm1405_vm3, %v1481_v28, %v1477_v1  ;;  %v1964_v1 = vld [vmem:[%s3174_s1] sm:$0xff]  ;;  %s2151_s1 = smov [#allocation8]  }
 0x21b   :  { %v421_v56 = vpop.xlane.xlu1 %420  ;;  %v1101_v58 = vpop.xlane.xlu0 %1100  ;;  %v1965_v31 = vadd.f32 1.0, %v1964_v1  ;;  %s1998_s28 = sshll.u32 %s2151_s1, 4  ;;  %s1999_s28 = int_to_ptr.vmem [resolvable:$true] %s1998_s28 }
 0x21c   :  { %v1841_v35 = vrot.slane %v1101_v58, %v2683_v10  ;;  %v1246_v14 = vrot.slane %v421_v56, %v2546_v4  ;;  %s2113_s29 = scalar_lea.vmem %s1999_s28, 128  ;;  %p2118_p3 = scmp.lt.s32.totalorder %s1999_s28, %s1999_s28 }
 0x21d   :  { %p2114_p2 = scmp.ne.s32.totalorder %s1999_s28, %s2113_s29  ;;  %p2119_p4 = scmp.lt.s32.totalorder %s2113_s29, %s2113_s29 }
 0x21e   :  { %v1842_v44 = vsel %vm3196_vm14, %v1841_v35, %v1837_v53  ;;  %vm1342_vm14 = vcmask 1045509  }
 0x21f   :  { %v2962_v27 = vsel %vm1336_vm5, %v1842_v44, %v1938_v45  ;;  %v425_v0 = vpop.xlane.xlu1 %424  ;;  %v1111_v43 = vpop.xlane.xlu0 %1110  ;;  %vm3199_vm5 = vmmov %vm3194_vm8  ;;  %vm3202_vm8 = vcmask 261312   ;;  %p2120_p5 = por %p2119_p4, %p2118_p3 }
 0x220   :  { %v1865_v50 = vrot.slane %v1111_v43, %v2636_v46  ;;  %v1256_v41 = vrot.slane %v425_v0, %v3201_v40 }
 0x221   :  { %p2121_p6 = pnand %p2120_p5, %p2114_p2 }
 0x222   :  { %v1870_v15 = vsel %vm1789_vm7, %v1869_v2, %v1865_v50 }
 0x223   :  { %v649_v20 = vpop.xlane.xlu1 %648  ;;  %v889_v21 = vpop.xlane.xlu0 %888  ;;  %1974 = vperm.xlu1 %2045, %v1964_v1   ;;  %v1875_v7 = vsel %vm3197_vm11, %v1874_v11, %v1870_v15  ;;  %vm3205_vm11 = vmmov %vm3202_vm8 }
 0x224   :  { %v1680_v47 = vrot.slane %v889_v21, %v2658_v13  ;;  %v1452_v35 = vrot.slane %v649_v20, %v2564_v33 }
 0x226   :  { %v2974_v8 = vsel %vm1604_vm12, %v1680_v47, %v1676_v5 }
 0x227   :  { %v651_v52 = vpop.xlane.xlu1 %650  ;;  %v1117_v60 = vpop.xlane.xlu0 %1116  ;;  %2046 = vset.pattern.permute.xlu1 %v3198_v19 }
 0x228   :  { %v1879_v63 = vrot.slane %v1117_v60, %v2683_v10  ;;  %1958 = vperm.xlu1 %2046, %v2010_v29   ;;  %1968 = vperm.xlu0 %2044, %v1965_v31   ;;  %v1457_v0 = vrot.slane %v651_v52, %v2571_v48 }
 0x22a   :  { %v2979_v34 = vsel %vm3199_vm5, %v1879_v63, %v1875_v7 }
 0x22b   :  { %v875_v18 = vpop.xlane.xlu1 %874  ;;  %v419_v6 = vpop.xlane.xlu0 %418 }
 0x22c   :  { %v1242_v54 = vrot.slane %v419_v6, %v2537_v3  ;;  %2047 = vset.pattern.permute.xlu0 %v3200_v49  ;;  %v1647_v11 = vrot.slane %v875_v18, %v2593_v25 }
 0x22e   :  { %v1247_v45 = vsel %vm1185_vm0, %v1246_v14, %v1242_v54 }
 0x22f   :  { %v423_v59 = vpop.xlane.xlu0 %422  ;;  %v437_v26 = vpop.xlane.xlu1 %436 }
 0x230   :  { %v1251_v42 = vrot.slane %v423_v59, %v2530_v23  ;;  %v1284_v30 = vrot.slane %v437_v26, %v2546_v4 }
 0x232   :  { %v1252_v16 = vsel %vm1192_vm4, %v1251_v42, %v1247_v45 }
 0x233   :  { %v1257_v39 = vsel %vm3202_vm8, %v1256_v41, %v1252_v16  ;;  %v665_v55 = vpop.xlane.xlu1 %664  ;;  %v435_v36 = vpop.xlane.xlu0 %434  ;;  %vm1344_vm8 = vcmask 1046534  }
 0x234   :  { %v1339_v5 = vsel %vm1338_vm1, %v1257_v39, %v3203_v37  ;;  %v1280_v53 = vrot.slane %v435_v36, %v2537_v3  ;;  %v1490_v14 = vrot.slane %v665_v55, %v2564_v33 }
 0x235   :  { %v2995_v17 = vsel %vm1340_vm6, %v3204_v62, %v1339_v5 }
 0x236   :  { %v1285_v28 = vsel %vm1185_vm0, %v1284_v30, %v1280_v53 }
 0x237   :  { %v879_v56 = vpop.xlane.xlu1 %878  ;;  %v647_v58 = vpop.xlane.xlu0 %646 }
 0x238   :  { %v1448_v44 = vrot.slane %v647_v58, %v2561_v24  ;;  %v1656_v21 = vrot.slane %v879_v56, %v2614_v9 }
 0x23a   :  { %v1453_v43 = vsel %vm1391_vm9, %v1452_v35, %v1448_v44 }
 0x23b   :  { %v1103_v2 = vpop.xlane.xlu1 %1102  ;;  %v877_v50 = vpop.xlane.xlu0 %876  ;;  %v1458_v1 = vsel %vm1398_vm10, %v1457_v0, %v1453_v43 }
 0x23c   :  { %v1651_v15 = vrot.slane %v877_v50, %v2588_v57  ;;  %v1846_v42 = vrot.slane %v1103_v2, %v2636_v46 }
 0x23e   :  { %v1652_v7 = vsel %vm1590_vm13, %v1651_v15, %v1647_v11 }
 0x23f   :  { %v439_v47 = vpop.xlane.xlu1 %438  ;;  %v653_v20 = vpop.xlane.xlu0 %652  ;;  %v1657_v31 = vsel %vm1597_vm15, %v1656_v21, %v1652_v7 }
 0x240   :  { %v1289_v29 = vrot.slane %v439_v47, %v2530_v23  ;;  %v1462_v52 = vrot.slane %v653_v20, %v2627_v51 }
 0x242   :  { %v1290_v60 = vsel %vm1192_vm4, %v1289_v29, %v1285_v28  ;;  %v1463_v19 = vsel %vm1405_vm3, %v1462_v52, %v1458_v1 }
 0x243   :  { %v1542_v63 = vsel %vm1338_vm1, %v1463_v19, %v2896_v32  ;;  %v445_v18 = vpop.xlane.xlu1 %444  ;;  %v663_v6 = vpop.xlane.xlu0 %662 }
 0x244   :  { %v1486_v54 = vrot.slane %v663_v6, %v2561_v24  ;;  %v1543_v49 = vsel %vm1340_vm6, %v2957_v61, %v1542_v63  ;;  %v1303_v37 = vrot.slane %v445_v18, %v2546_v4 }
 0x246   :  { %v1491_v45 = vsel %vm1391_vm9, %v1490_v14, %v1486_v54 }
 0x247   :  { %v667_v59 = vpop.xlane.xlu1 %666  ;;  %v1105_v26 = vpop.xlane.xlu0 %1104 }
 0x248   :  { %v1495_v41 = vrot.slane %v667_v59, %v2571_v48  ;;  %v1850_v16 = vrot.slane %v1105_v26, %v2640_v12 }
 0x24a   :  { %v1496_v32 = vsel %vm1398_vm10, %v1495_v41, %v1491_v45  ;;  %v1851_v39 = vsel %vm1789_vm7, %v1850_v16, %v1846_v42 }
 0x24b   :  { %v673_v55 = vpop.xlane.xlu1 %672  ;;  %v443_v36 = vpop.xlane.xlu0 %442 }
 0x24c   :  { %v1299_v61 = vrot.slane %v443_v36, %v2537_v3  ;;  %v1509_v62 = vrot.slane %v673_v55, %v2564_v33 }
 0x24e   :  { %v1304_v5 = vsel %vm1185_vm0, %v1303_v37, %v1299_v61 }
 0x24f   :  { %v893_v30 = vpop.xlane.xlu1 %892  ;;  %v671_v53 = vpop.xlane.xlu0 %670 }
 0x250   :  { %v1505_v28 = vrot.slane %v671_v53, %v2561_v24  ;;  %v1689_v15 = vrot.slane %v893_v30, %v2588_v57 }
 0x252   :  { %v1510_v56 = vsel %vm1391_vm9, %v1509_v62, %v1505_v28 }
 0x253   :  { %v1107_v58 = vpop.xlane.xlu1 %1106  ;;  %v881_v35 = vpop.xlane.xlu0 %880 }
 0x254   :  { %v1855_v44 = vrot.slane %v1107_v58, %v2672_v22  ;;  %v1661_v0 = vrot.slane %v881_v35, %v2658_v13 }
 0x256   :  { %v1856_v43 = vsel %vm3195_vm2, %v1855_v44, %v1851_v39  ;;  %v1662_v2 = vsel %vm1604_vm12, %v1661_v0, %v1657_v31  ;;  %vm3206_vm2 = vmmov %vm3205_vm11 }
 0x257   :  { %v1741_v50 = vsel %vm1338_vm1, %v1662_v2, %v2944_v38  ;;  %v447_v1 = vpop.xlane.xlu1 %446  ;;  %v891_v11 = vpop.xlane.xlu0 %890 }
 0x258   :  { %v1308_v21 = vrot.slane %v447_v1, %v2530_v23  ;;  %v1685_v7 = vrot.slane %v891_v11, %v2593_v25  ;;  %v1742_v47 = vsel %vm1340_vm6, %v2974_v8, %v1741_v50 }
 0x25a   :  { %v1309_v20 = vsel %vm1192_vm4, %v1308_v21, %v1304_v5  ;;  %v1690_v29 = vsel %vm1590_vm13, %v1689_v15, %v1685_v7 }
 0x25b   :  { %v675_v52 = vpop.xlane.xlu1 %674  ;;  %v441_v31 = vpop.xlane.xlu0 %440 }
 0x25c   :  { %v1514_v19 = vrot.slane %v675_v52, %v2571_v48  ;;  %v1294_v38 = vrot.slane %v441_v31, %v3201_v40 }
 0x25e   :  { %v1515_v63 = vsel %vm1398_vm10, %v1514_v19, %v1510_v56  ;;  %v1295_v18 = vsel %vm3205_vm11, %v1294_v38, %v1290_v60 }
 0x25f   :  { %v1343_v6 = vsel %vm1342_vm14, %v1295_v18, %v2995_v17  ;;  %v895_v14 = vpop.xlane.xlu1 %894  ;;  %v669_v8 = vpop.xlane.xlu0 %668 }
 0x260   :  { %v1500_v54 = vrot.slane %v669_v8, %v2627_v51  ;;  %v1694_v28 = vrot.slane %v895_v14, %v2614_v9 }
 0x262   :  { %v1501_v45 = vsel %vm1405_vm3, %v1500_v54, %v1496_v32  ;;  %v1695_v0 = vsel %vm1597_vm15, %v1694_v28, %v1690_v29 }
 0x263   :  { %v1544_v59 = vsel %vm1342_vm14, %v1501_v45, %v1543_v49  ;;  %v3052_v26 = vpop.xlane.xlu1 %900  ;;  %v3054_v42 = vpop.xlane.xlu0 %898 }
 0x267   :  { %v3056_v41 = vpop.xlane.xlu1 %1120  ;;  %v1109_v16 = vpop.xlane.xlu0 %1108 }
 0x268   :  { %v1860_v60 = vrot.slane %v1109_v16, %v2683_v10 }
 0x26a   :  { %v1861_v39 = vsel %vm3199_vm5, %v1860_v60, %v1856_v43 }
 0x26b   :  { %v1940_v17 = vsel %vm1338_vm1, %v1861_v39, %v2962_v27  ;;  %v3062_v55 = vpop.xlane.xlu1 %902  ;;  %v3064_v36 = vpop.xlane.xlu0 %1118  ;;  %vm1346_vm1 = vcmask 1047559  }
 0x26c   :  { %v3068_v49 = vsel %vm1340_vm6, %v2979_v34, %v1940_v17  ;;  %v1713_v60 = vrot.slane %v3062_v55, %v2614_v9  ;;  %v1884_v39 = vrot.slane %v3064_v36, %v2636_v46  ;;  %vm1949_vm6 = vcmask 785408  }
 0x26f   :  { %v3070_v32 = vpop.xlane.xlu1 %1122  ;;  %v449_v37 = vpop.xlane.xlu0 %448 }
 0x270   :  { %v1313_v61 = vrot.slane %v449_v37, %v3201_v40 }
 0x272   :  { %v1314_v5 = vsel %vm3206_vm2, %v1313_v61, %v1309_v20 }
 0x273   :  { %v1345_v30 = vsel %vm1344_vm8, %v1314_v5, %v1343_v6  ;;  %v3075_v53 = vpop.xlane.xlu1 %1128  ;;  %v677_v27 = vpop.xlane.xlu0 %676 }
 0x274   :  { %v1519_v62 = vrot.slane %v677_v27, %v2627_v51 }
 0x276   :  { %v1520_v34 = vsel %vm1405_vm3, %v1519_v62, %v1515_v63 }
 0x277   :  { %v1545_v56 = vsel %vm1344_vm8, %v1520_v34, %v1544_v59  ;;  %v3081_v58 = vpop.xlane.xlu1 %1130  ;;  %v897_v35 = vpop.xlane.xlu0 %896 }
 0x278   :  { %v1699_v44 = vrot.slane %v897_v35, %v2658_v13  ;;  %v1907_v35 = vrot.slane %v3075_v53, %v2640_v12 }
 0x27a   :  { %v1700_v43 = vsel %vm1604_vm12, %v1699_v44, %v1695_v0 }
 0x27b   :  { %v3087_v2 = vsel %vm1342_vm14, %v1700_v43, %v1742_v47  ;;  %v3089_v50 = vpop.xlane.xlu1 %1132  ;;  %v1127_v1 = vpop.xlane.xlu0 %1126 }
 0x27c   :  { %v1903_v55 = vrot.slane %v1127_v1, %v2636_v46 }
 0x27f   :  { %v905_v11 = vpop.xlane.xlu0 %904  ;;  %v453_v15 = vpop.xlane.xlu1 %452 }
 0x280   :  { %v1322_v47 = vrot.slane %v453_v15, %v2546_v4  ;;  %v1708_v4 = vrot.slane %v3052_v26, %v2588_v57  ;;  %v1893_v26 = vrot.slane %v3070_v32, %v2672_v22  ;;  %v1718_v17 = vrot.slane %v905_v11, %v2658_v13 }
 0x281   :  { %v1888_v32 = vrot.slane %v3056_v41, %v2640_v12  ;;  %v1908_v41 = vsel %vm1789_vm7, %v1907_v35, %v1903_v55  ;;  %v1912_v11 = vrot.slane %v3081_v58, %v2672_v22 }
 0x283   :  { %v1125_v21 = vpop.xlane.xlu0 %1124  ;;  %v681_v7 = vpop.xlane.xlu1 %680 }
 0x284   :  { %v1528_v6 = vrot.slane %v681_v7, %v2564_v33  ;;  %v1704_v33 = vrot.slane %v3054_v42, %v2593_v25  ;;  %v1898_v34 = vrot.slane %v1125_v21, %v2683_v10 }
 0x286   :  { %v1709_v28 = vsel %vm1590_vm13, %v1708_v4, %v1704_v33 }
 0x287   :  { %v455_v20 = vpop.xlane.xlu1 %454  ;;  %v451_v52 = vpop.xlane.xlu0 %450 }
 0x288   :  { %v1318_v38 = vrot.slane %v451_v52, %v2537_v3  ;;  %v1327_v14 = vrot.slane %v455_v20, %v2530_v23  ;;  %v3211_v52 = vld [vmem:[#allocation12_spill] sm:$0xff] }
 0x28a   :  { %v1323_v54 = vsel %vm1185_vm0, %v1322_v47, %v1318_v38  ;;  %vm3207_vm0 = vmmov %vm3206_vm2 }
 0x28b   :  { %v683_v31 = vpop.xlane.xlu1 %682  ;;  %v679_v19 = vpop.xlane.xlu0 %678 }
 0x28c   :  { %v1524_v29 = vrot.slane %v679_v19, %v2561_v24  ;;  %v1533_v8 = vrot.slane %v683_v31, %v2571_v48  ;;  %v1328_v48 = vsel %vm1192_vm4, %v1327_v14, %v1323_v54  ;;  %vm3208_vm4 = vcmask 261120  }
 0x28d   :  { %v1962_v31 = vcvt.s32.f32 %v3211_v52  ;;  %v1917_v19 = vrot.slane %v3089_v50, %v2683_v10 }
 0x28e   :  { %v1529_v45 = vsel %vm1391_vm9, %v1528_v6, %v1524_v29  ;;  %vm1947_vm9 = vcmask 523264  }
 0x28f   :  { %v909_v63 = vpop.xlane.xlu1 %908  ;;  %v907_v18 = vpop.xlane.xlu0 %906  ;;  %v1534_v23 = vsel %vm1398_vm10, %v1533_v8, %v1529_v45  ;;  %vm3209_vm10 = vcmask 982912   ;;  %v1963_v45 = vadd.f32 1.0, %v1962_v31 }
 0x290   :  { %v1727_v27 = vrot.slane %v909_v63, %v2588_v57  ;;  %v1723_v36 = vrot.slane %v907_v18, %v2593_v25  ;;  %v1889_v57 = vsel %vm1789_vm7, %v1888_v32, %v1884_v39 }
 0x291   :  { %v1894_v43 = vsel %vm3209_vm10, %v1893_v26, %v1889_v57 }
 0x292   :  { %v1728_v1 = vsel %vm1590_vm13, %v1727_v27, %v1723_v36  ;;  %vm3212_vm13 = vmmov %vm3209_vm10 }
 0x293   :  { %v685_v59 = vpop.xlane.xlu1 %684  ;;  %v457_v16 = vpop.xlane.xlu0 %456 }
 0x294   :  { %v1538_v3 = vrot.slane %v685_v59, %v2627_v51  ;;  %v1332_v24 = vrot.slane %v457_v16, %v3201_v40 }
 0x296   :  { %v1539_v51 = vsel %vm1405_vm3, %v1538_v3, %v1534_v23  ;;  %v1333_v40 = vsel %vm3207_vm0, %v1332_v24, %v1328_v48  ;;  %vm3210_vm3 = vmmov %vm3199_vm5 }
 0x297   :  { %v1546_v42 = vsel %vm1346_vm1, %v1539_v51, %v1545_v56  ;;  %v1347_v37 = vsel %vm1346_vm1, %v1333_v40, %v1345_v30  ;;  %v911_v61 = vpop.xlane.xlu1 %910  ;;  %v1135_v5 = vpop.xlane.xlu0 %1134  ;;  %v1714_v30 = vsel %vm1597_vm15, %v1713_v60, %v1709_v28  ;;  %v1899_v53 = vsel %vm3210_vm3, %v1898_v34, %v1894_v43  ;;  %vm3215_vm11 = vmmov %vm3210_vm3 }
 0x298   :  { %v1946_v62 = vsel %vm3208_vm4, %v1347_v37, %v1546_v42  ;;  %v1732_v56 = vrot.slane %v911_v61, %v2614_v9  ;;  %v1719_v25 = vsel %vm1604_vm12, %v1718_v17, %v1714_v30  ;;  %v1922_v58 = vrot.slane %v1135_v5, %v2636_v46 }
 0x299   :  { %v1744_v7 = vsel %vm1344_vm8, %v1719_v25, %v3087_v2 }
 0x29a   :  { %v1733_v15 = vsel %vm1597_vm15, %v1732_v56, %v1728_v1  ;;  %vm3213_vm15 = vmmov %vm3209_vm10 }
 0x29b   :  { %v1137_v44 = vpop.xlane.xlu1 %1136  ;;  %v913_v0 = vpop.xlane.xlu0 %912 }
 0x29c   :  { %v1737_v9 = vrot.slane %v913_v0, %v2658_v13  ;;  %v1926_v21 = vrot.slane %v1137_v44, %v2640_v12  ;;  %v1913_v13 = vsel %vm3212_vm13, %v1912_v11, %v1908_v41  ;;  %v1942_v12 = vsel %vm1342_vm14, %v1899_v53, %v3068_v49 }
 0x29d   :  { %vm1979_vm14 = vcmp.eq.f32.partialorder %v1963_v45, 1.0 }
 0x29e   :  { %v1738_v20 = vsel %vm1604_vm12, %v1737_v9, %v1733_v15  ;;  %v1927_v6 = vsel %vm1789_vm7, %v1926_v21, %v1922_v58  ;;  %vm3214_vm12 = vmmov %vm3210_vm3 }
 0x29f   :  { %v1141_v38 = vpop.xlane.xlu1 %1140  ;;  %v1139_v29 = vpop.xlane.xlu0 %1138  ;;  %v1745_v63 = vsel %vm1346_vm1, %v1738_v20, %v1744_v7  ;;  %v1918_v14 = vsel %vm3214_vm12, %v1917_v19, %v1913_v13 }
 0x2a0   :  { %v1936_v2 = vrot.slane %v1141_v38, %v2683_v10  ;;  %v1931_v18 = vrot.slane %v1139_v29, %v2672_v22  ;;  %v1948_v47 = vsel %vm1947_vm9, %v1946_v62, %v1745_v63  ;;  %v1943_v8 = vsel %vm1344_vm8, %v1918_v14, %v1942_v12 }
 0x2a2   :  { %v1932_v50 = vsel %vm3213_vm15, %v1931_v18, %v1927_v6 }
 0x2a3   :  { %v1975_v46 = vpop.permute.xlu1 %1974  ;;  %v1937_v54 = vsel %vm3215_vm11, %v1936_v2, %v1932_v50 }
 0x2a4   :  { %v1944_v49 = vsel %vm1346_vm1, %v1937_v54, %v1943_v8  ;;  %vm1977_vm5 = vcmp.le.f32.partialorder %v1963_v45, %v1975_v46 }
 0x2a5   :  { %v1950_v10 = vsel %vm1949_vm6, %v1948_v47, %v1944_v49 }
 0x2a7   :  { %v1959_v59 = vpop.permute.xlu1 %1958  ;;  %v1969_v22 = vpop.permute.xlu0 %1968 }
 0x2a8   :  { %v1961_v16 = vadd.f32 %v1959_v59, %v1950_v10  ;;  %vm1971_vm7 = vcmp.ge.f32.partialorder %v1963_v45, %v1969_v22 }
 0x2a9   :  { %vm1978_vm2 = vmand %vm1971_vm7, %vm1977_vm5 }
 0x2aa   :  { %vm1980_vm0 = vmor %vm1978_vm2, %vm1979_vm14 }
 0x2ab   :  { %v1981_v3 = vsel %vm1980_vm0, %v1961_v16, -1e+30 }
 0x2ac   :  { %1982 = vmax.xlane.f32.xlu1 %v1981_v3 }
 0x339   :  { %v1983_v24 = vpop.xlane.xlu1 %1982 }
 0x33a   :  { %v1984_v4 = vsub.f32 %v1981_v3, %v1983_v24 }
 0x33c   :  { %v1985_v33 = vmul.f32 1.442695, %v1984_v4 }
 0x33e   :  { %2048 = vpow2.f32 %v1985_v33 }
 0x348   :  { %v2049_v23 = vpop.eup %2048 }
 0x349   :  { %1987 = vadd.xlane.f32.xlu0 %v2049_v23 }
 0x3d6   :  { %v1988_v48 = vpop.xlane.xlu0 %1987 }
 0x3d7   :  { %2050 = vrcp.f32 %v1988_v48 }
 0x3e1   :  { %v2051_v60 = vpop.eup %2050 }
 0x3e2   :  { %v1990_v39 = vmul.f32 %v2051_v60, %v2049_v23 }
 0x3e4   :  { %1991 = vst [vmem:[#allocation8] sm:$0xff] %v1990_v39 }
 0x3e5   :  { %2124 = shalt.err (!%p2121_p6)
}
 0x3e6   :  { %s2125_s5 = scalar_lea.hbm %s3179_s6, 128 }
 0x3e7   :  { %p2126_p7 = scmp.ne.s32.totalorder %s3179_s6, %s2125_s5  ;;  %p2129_p8 = scmp.lt.u32.totalorder %s2125_s5, %s3179_s6 }
 0x3e9   :  { %p2131_p9 = pnand %p2129_p8, %p2126_p7 }
 0x3eb   :  { %2134 = shalt.err (!%p2131_p9)
}
 0x3ec   :  { %2001 = dma.vmem_to_hbm [thread:$0]  %s1999_s28, 128, %s3179_s6, [#allocation5]  }
 0x3ed   :  { %2139 = dma.done.wait [#allocation5], 128  }
 0x3ee   :  { %2140 = vsyncadd [#allocation5], 4294967168 }
 0x3ef   :  { %2005 = vsyncpa [#allocation4], 1 }
 0x3f0   :  { %2006 = vsyncpa [#allocation7], 1 }
 0x3f1   :  { %2007 = vsyncpa [#allocation5], 1 }

</bundles_post_ra>
